<compile_context>
chip_gen: v7x
topology: tpu7x:2x2x1
jax: 0.10.0
libtpu: 0.0.40
codegen_flags: <defaults>
</compile_context>

<pallas_src>
import functools

import jax
import jax.numpy as jnp
from jax.experimental import pallas as pl
from jax.experimental.pallas import tpu as pltpu


def _round_up(v, m):
    return (v + m - 1) // m * m


def _tpu_vmem_and_cores():
    """(vmem_limit_bytes, block_budget_bytes, num_tensorcores) for this chip."""
    cap = 128 << 20
    info = None
    try:
        info = pltpu.get_tpu_info()
        cap = int(getattr(info, "vmem_capacity_bytes", cap)) or cap
    except Exception:  # interpret mode / unknown target: conservative defaults
        pass
    cores = None
    if info is not None:
        for name in ("num_cores", "core_count", "num_tensorcores",
                     "tensorcores_per_chip", "num_cores_per_chip"):
            v = getattr(info, name, None)
            if isinstance(v, int) and v > 0:
                cores = v
                break
    if cores is None:
        # Heuristic: 64 MiB VMEM per core -> v7x (2 TC/chip); 128 MiB -> v5e/v6e.
        cores = 2 if cap <= (64 << 20) else 1
    vmem_limit = (cap * 3) // 4                          # ~96 MiB v5e/v6e, ~48 MiB v7x
    block_budget = max(4 << 20, vmem_limit - (8 << 20))  # weights/scratch headroom
    return vmem_limit, block_budget, cores


def _padded_bytes(c, hw, itemsize):
    """VMEM bytes of one (c, hw) image slab including sublane/lane padding."""
    sub = max(8, 32 // itemsize)         # sublane packing: 8 for f32, 16 for bf16
    return _round_up(c, sub) * _round_up(hw, 128) * itemsize


def _pick_b_tile(batch, per_image_bytes, block_budget, num_cores):
    """Largest divisor of `batch` whose double-buffered in+out blocks fit the
    budget; on multi-TensorCore chips prefer an even grid-step split."""
    max_tile = max(1, min(batch, block_budget // (4 * per_image_bytes)))
    divisors = [t for t in range(1, max_tile + 1) if batch % t == 0]
    if num_cores > 1:
        even = [t for t in divisors if (batch // t) % num_cores == 0]
        if even:
            return even[-1]
    return divisors[-1]


def _pick_hw_tile(hw, c, itemsize, block_budget):
    """HW tile (multiple of 128) for the two-pass path; prefers exact divisors."""
    sub = max(8, 32 // itemsize)
    per_lane_col = 4 * _round_up(c, sub) * itemsize      # 2 bufs x (in + out)
    max_hw = max(128, (block_budget // per_lane_col) // 128 * 128)
    max_hw = min(max_hw, _round_up(hw, 128))
    for t in range(max_hw, 127, -128):
        if hw % t == 0:
            return t
    return max_hw       # last tile is partial; squeeze kernel masks padded lanes


# --------------------------- Path A: fused kernel --------------------------- #

def _se_fused_kernel(x_ref, w1_ref, b1_ref, w2_ref, b2_ref, o_ref):
    # Block: x_ref / o_ref are (b_tile, C, HW); weights stay resident
    # (constant index maps).  Squeeze: mean over the spatial (lane) axis, f32.
    inv_hw = 1.0 / x_ref.shape[-1]
    sq = jnp.sum(x_ref[...].astype(jnp.float32), axis=-1) * inv_hw     # (b_tile, C)

    # Excitation MLP (tiny MXU matmuls): fc1 -> ReLU -> fc2 -> sigmoid.
    h = jnp.dot(sq, w1_ref[...], preferred_element_type=jnp.float32) + b1_ref[...]
    h = jnp.maximum(h, 0.0)                                            # (b_tile, hid)
    e = jnp.dot(h, w2_ref[...], preferred_element_type=jnp.float32) + b2_ref[...]

    # Residual folded into the per-channel scale: x*s + x == x*(s + 1).
    # (For bf16 inputs this rounds once instead of twice vs. the reference.)
    scale = (jax.nn.sigmoid(e) + 1.0).astype(x_ref.dtype)              # (b_tile, C)

    # Re-read the ref (stream from VMEM) instead of keeping the multi-MiB
    # block live across the reduce/matmul region (avoids vreg pressure/spills).
    o_ref[...] = x_ref[...] * scale[:, :, None]


# ----------------------- Path B: two-pass (HW tiled) ------------------------ #

def _make_squeeze_kernel(hw_total, hw_tile):
    ragged = (hw_total % hw_tile) != 0

    def kernel(x_ref, sq_ref):
        k = pl.program_id(1)

        @pl.when(k == 0)
        def _():
            sq_ref[...] = jnp.zeros_like(sq_ref)

        xb = x_ref[...].astype(jnp.float32)                 # (1, C, hw_tile)
        if ragged:
            lane = jax.lax.broadcasted_iota(jnp.int32, xb.shape, dimension=2)
            xb = jnp.where(k * hw_tile + lane < hw_total, xb, 0.0)
        sq_ref[...] += jnp.sum(xb, axis=-1)

    return kernel


def _scale_kernel(x_ref, s_ref, o_ref):
    o_ref[...] = x_ref[...] * s_ref[...][:, :, None]


# --------------------------------- Wrapper ---------------------------------- #

def squeeze_excitation(x_nchw, w1, b1, w2, b2, *, _block_budget_override=None):
    """x_nchw: (B, C, H, W).  w1: (hidden, C), b1: (hidden,), w2: (C, hidden),
    b2: (C,).  Returns x * sigmoid(fc2(relu(fc1(avgpool(x))))) + x  (NCHW)."""
    B, C, H, W = x_nchw.shape
    hidden = w1.shape[0]
    HW = H * W
    itemsize = x_nchw.dtype.itemsize

    # Free reshape to (B, C, HW): C on sublanes, HW on lanes.  No transpose.
    # NOTE: lane-dense (unmasked vst) only when HW % 128 == 0; for 7x7 / 14x14
    # maps the stores are masked and VMEM blocks inflate (budget math above
    # accounts for the inflation so it stays correct, just slower).
    # TODO(synk): optional lane-repacking path for HW % 128 != 0.
    x = x_nchw.reshape(B, C, HW)
    w1t = w1.T                                   # (C, hidden)
    w2t = w2.T                                   # (hidden, C)
    b1r = b1.reshape(1, hidden)
    b2r = b2.reshape(1, C)

    vmem_limit, block_budget, cores = _tpu_vmem_and_cores()
    if _block_budget_override is not None:
        block_budget = _block_budget_override
    per_image = _padded_bytes(C, HW, itemsize)

    x_bytes = B * C * HW * itemsize
    weight_bytes = (w1.size + b1.size + w2.size + b2.size) * 4

    if 4 * per_image <= block_budget:
        # ---- Path A: one (b_tile, C, HW) slab per grid step, fused kernel. ----
        b_tile = _pick_b_tile(B, per_image, block_budget, cores)
        out = pl.pallas_call(
            _se_fused_kernel,
            out_shape=jax.ShapeDtypeStruct((B, C, HW), x.dtype),
            grid_spec=pltpu.PrefetchScalarGridSpec(
                num_scalar_prefetch=0,
                grid=(B // b_tile,),
                in_specs=[
                    pl.BlockSpec((b_tile, C, HW), lambda b: (b, 0, 0)),
                    pl.BlockSpec((C, hidden), lambda b: (0, 0)),
                    pl.BlockSpec((1, hidden), lambda b: (0, 0)),
                    pl.BlockSpec((hidden, C), lambda b: (0, 0)),
                    pl.BlockSpec((1, C), lambda b: (0, 0)),
                ],
                out_specs=pl.BlockSpec((b_tile, C, HW), lambda b: (b, 0, 0)),
            ),
            compiler_params=pltpu.CompilerParams(
                dimension_semantics=("parallel",),
                vmem_limit_bytes=vmem_limit),
            cost_estimate=pl.CostEstimate(
                flops=2 * B * C * HW + 4 * B * C * hidden,
                transcendentals=B * C,
                bytes_accessed=2 * x_bytes + weight_bytes),
            input_output_aliases={0: 0},
        )(x, w1t, b1r, w2t, b2r)
        return out.reshape(B, C, H, W)

    # ---- Path B: per-image slab exceeds the VMEM budget (e.g. very large
    # H*W on v7x's 64 MiB).  Two HW-tiled passes: squeeze-accumulate kernel,
    # tiny excitation MLP in plain JAX, then an HW-tiled scale kernel. ----
    hw_tile = _pick_hw_tile(HW, C, itemsize, block_budget)
    n_hw = pl.cdiv(HW, hw_tile)

    sq_sum = pl.pallas_call(
        _make_squeeze_kernel(HW, hw_tile),
        out_shape=jax.ShapeDtypeStruct((B, C), jnp.float32),
        grid_spec=pltpu.PrefetchScalarGridSpec(
            num_scalar_prefetch=0,
            grid=(B, n_hw),
            in_specs=[pl.BlockSpec((1, C, hw_tile), lambda b, k: (b, 0, k))],
            out_specs=pl.BlockSpec((1, C), lambda b, k: (b, 0)),
        ),
        compiler_params=pltpu.CompilerParams(
            dimension_semantics=("parallel", "arbitrary"),
            vmem_limit_bytes=vmem_limit),
        cost_estimate=pl.CostEstimate(
            flops=B * C * HW, transcendentals=0,
            bytes_accessed=x_bytes + B * C * 4),
    )(x)

    # Tiny (B, C) excitation MLP; negligible next to streaming x through HBM.
    sq = sq_sum * (1.0 / HW)
    h = jnp.maximum(sq @ w1t + b1r, 0.0)
    e = h @ w2t + b2r
    scale = (jax.nn.sigmoid(e) + 1.0).astype(x.dtype)          # (B, C)

    out = pl.pallas_call(
        _scale_kernel,
        out_shape=jax.ShapeDtypeStruct((B, C, HW), x.dtype),
        grid_spec=pltpu.PrefetchScalarGridSpec(
            num_scalar_prefetch=0,
            grid=(B, n_hw),
            in_specs=[pl.BlockSpec((1, C, hw_tile), lambda b, k: (b, 0, k)),
                      pl.BlockSpec((1, C), lambda b, k: (b, 0))],
            out_specs=pl.BlockSpec((1, C, hw_tile), lambda b, k: (b, 0, k)),
        ),
        compiler_params=pltpu.CompilerParams(
            dimension_semantics=("parallel", "parallel"),
            vmem_limit_bytes=vmem_limit),
        cost_estimate=pl.CostEstimate(
            flops=B * C * HW, transcendentals=0,
            bytes_accessed=2 * x_bytes + B * C * itemsize),
        input_output_aliases={0: 0},
    )(x, scale)
    return out.reshape(B, C, H, W)


def _reference(x_nchw, w1, b1, w2, b2):
    sq = jnp.mean(x_nchw, axis=(2, 3))                               # (B, C)
    h = jnp.maximum(sq @ w1.T + b1, 0.0)
    e = jax.nn.sigmoid(h @ w2.T + b2)                                # (B, C)
    return x_nchw * e[:, :, None, None] + x_nchw


if __name__ == "__main__":
    # Small shapes consistent with the module (reduction_ratio=16 divides C);
    # H*W = 256 keeps the lane axis a multiple of 128 (dense stores).
    B, C, H, W = 4, 128, 16, 16
    reduction = 16
    hidden = C // reduction

    key = jax.random.PRNGKey(0)
    kx, k1, k2, k3, k4 = jax.random.split(key, 5)

    x = jax.random.normal(kx, (B, C, H, W), dtype=jnp.float32)
    # Deterministic parameter init (nn.Linear-style uniform fan-in bounds).
    bound1 = 1.0 / (C ** 0.5)
    bound2 = 1.0 / (hidden ** 0.5)
    w1 = jax.random.uniform(k1, (hidden, C), jnp.float32, -bound1, bound1)
    b1 = jax.random.uniform(k2, (hidden,), jnp.float32, -bound1, bound1)
    w2 = jax.random.uniform(k3, (C, hidden), jnp.float32, -bound2, bound2)
    b2 = jax.random.uniform(k4, (C,), jnp.float32, -bound2, bound2)

    ref = jax.block_until_ready(_reference(x, w1, b1, w2, b2))

    # Path A (fused single-slab kernel); caller donates the input so the
    # aliased output reuses its HBM buffer.
    se = jax.jit(squeeze_excitation, donate_argnums=(0,))
    out_a = jax.block_until_ready(se(jnp.copy(x), w1, b1, w2, b2))
    assert out_a.shape == (B, C, H, W)
    assert jnp.allclose(out_a, ref, atol=2e-5, rtol=2e-5), "path A mismatch"

    # Path B (two-pass HW-tiled fallback), forced via a tiny block budget so
    # both code paths are exercised and verified at these small shapes.
    two_pass = jax.jit(functools.partial(
        squeeze_excitation, _block_budget_override=256 * 1024))
    out_b = jax.block_until_ready(two_pass(jnp.copy(x), w1, b1, w2, b2))
    assert jnp.allclose(out_b, ref, atol=2e-5, rtol=2e-5), "path B mismatch"

    print("KERNEL_OK")
</pallas_src>

<mosaic_0001>
module attributes {stable_mosaic.version = 11 : i64} {
  func.func @_se_fused_kernel(%arg0: i32, %arg1: memref<4x128x256xf32, #tpu.memory_space<vmem>>, %arg2: memref<128x8xf32, #tpu.memory_space<vmem>>, %arg3: memref<1x8xf32, #tpu.memory_space<vmem>>, %arg4: memref<8x128xf32, #tpu.memory_space<vmem>>, %arg5: memref<1x128xf32, #tpu.memory_space<vmem>>, %arg6: memref<4x128x256xf32, #tpu.memory_space<vmem>>) attributes {dimension_semantics = [#tpu.dimension_semantics<parallel>], iteration_bounds = array<i64: 1>, scalar_prefetch = 0 : i64, scratch_operands = 0 : i64, tpu.core_type = #tpu.core_type<tc>, window_params = [{transform_indices = @transform_0, window_bounds = array<i64: 4, 128, 256>}, {pipeline_mode = #tpu.pipeline_mode<synchronous>, transform_indices = @transform_1, window_bounds = array<i64: 128, 8>}, {pipeline_mode = #tpu.pipeline_mode<synchronous>, transform_indices = @transform_2, window_bounds = array<i64: 1, 8>}, {pipeline_mode = #tpu.pipeline_mode<synchronous>, transform_indices = @transform_3, window_bounds = array<i64: 8, 128>}, {pipeline_mode = #tpu.pipeline_mode<synchronous>, transform_indices = @transform_4, window_bounds = array<i64: 1, 128>}, {transform_indices = @transform_5, window_bounds = array<i64: 4, 128, 256>}]} {
    %c0 = arith.constant 0 : index
    %c0_0 = arith.constant 0 : index
    %c0_1 = arith.constant 0 : index
    %0 = vector.load %arg1[%c0, %c0_0, %c0_1] : memref<4x128x256xf32, #tpu.memory_space<vmem>>, vector<4x128x256xf32>
    %cst = arith.constant dense<0.000000e+00> : vector<4x128xf32>
    %1 = vector.multi_reduction <add>, %0, %cst [2] : vector<4x128x256xf32> to vector<4x128xf32>
    %cst_2 = arith.constant 3.906250e-03 : f32
    %2 = vector.broadcast %cst_2 : f32 to vector<4x128xf32>
    %3 = arith.mulf %1, %2 : vector<4x128xf32>
    %c0_3 = arith.constant 0 : index
    %c0_4 = arith.constant 0 : index
    %4 = vector.load %arg2[%c0_3, %c0_4] : memref<128x8xf32, #tpu.memory_space<vmem>>, vector<128x8xf32>
    %cst_5 = arith.constant dense<0.000000e+00> : vector<4x8xf32>
    %5 = tpu.matmul %3, %4, %cst_5 {dimension_numbers = #tpu.dot_dimension_numbers<[1], [0], [0], [1], [0, 0, 1, 1], [], []>} : vector<4x128xf32>, vector<128x8xf32>, vector<4x8xf32> -> vector<4x8xf32>
    %c0_6 = arith.constant 0 : index
    %c0_7 = arith.constant 0 : index
    %6 = vector.load %arg3[%c0_6, %c0_7] : memref<1x8xf32, #tpu.memory_space<vmem>>, vector<1x8xf32>
    %7 = vector.broadcast %6 : vector<1x8xf32> to vector<4x8xf32>
    %8 = arith.addf %5, %7 : vector<4x8xf32>
    %cst_8 = arith.constant 0.000000e+00 : f32
    %9 = vector.broadcast %cst_8 : f32 to vector<4x8xf32>
    %10 = arith.maximumf %8, %9 : vector<4x8xf32>
    %c0_9 = arith.constant 0 : index
    %c0_10 = arith.constant 0 : index
    %11 = vector.load %arg4[%c0_9, %c0_10] : memref<8x128xf32, #tpu.memory_space<vmem>>, vector<8x128xf32>
    %cst_11 = arith.constant dense<0.000000e+00> : vector<4x128xf32>
    %12 = tpu.matmul %10, %11, %cst_11 {dimension_numbers = #tpu.dot_dimension_numbers<[1], [0], [0], [1], [0, 0, 1, 1], [], []>} : vector<4x8xf32>, vector<8x128xf32>, vector<4x128xf32> -> vector<4x128xf32>
    %c0_12 = arith.constant 0 : index
    %c0_13 = arith.constant 0 : index
    %13 = vector.load %arg5[%c0_12, %c0_13] : memref<1x128xf32, #tpu.memory_space<vmem>>, vector<1x128xf32>
    %14 = vector.broadcast %13 : vector<1x128xf32> to vector<4x128xf32>
    %15 = arith.addf %12, %14 : vector<4x128xf32>
    %16 = arith.negf %15 : vector<4x128xf32>
    %17 = math.exp %16 : vector<4x128xf32>
    %cst_14 = arith.constant 1.000000e+00 : f32
    %18 = vector.broadcast %cst_14 : f32 to vector<4x128xf32>
    %19 = arith.addf %18, %17 : vector<4x128xf32>
    %20 = arith.divf %18, %19 : vector<4x128xf32>
    %cst_15 = arith.constant 1.000000e+00 : f32
    %21 = vector.broadcast %cst_15 : f32 to vector<4x128xf32>
    %22 = arith.addf %20, %21 : vector<4x128xf32>
    %c0_16 = arith.constant 0 : index
    %c0_17 = arith.constant 0 : index
    %c0_18 = arith.constant 0 : index
    %23 = vector.load %arg1[%c0_16, %c0_17, %c0_18] : memref<4x128x256xf32, #tpu.memory_space<vmem>>, vector<4x128x256xf32>
    %24 = vector.shape_cast %22 : vector<4x128xf32> to vector<4x128x1xf32>
    %25 = vector.broadcast %24 : vector<4x128x1xf32> to vector<4x128x256xf32>
    %26 = arith.mulf %23, %25 : vector<4x128x256xf32>
    %c0_19 = arith.constant 0 : index
    %c0_20 = arith.constant 0 : index
    %c0_21 = arith.constant 0 : index
    %27 = vector.load %arg6[%c0_19, %c0_20, %c0_21] : memref<4x128x256xf32, #tpu.memory_space<vmem>>, vector<4x128x256xf32>
    tpu.vector_store %arg6[%c0_19, %c0_20, %c0_21], %26 {strides = array<i32>} : memref<4x128x256xf32, #tpu.memory_space<vmem>>, vector<4x128x256xf32>,
    return
  }
  func.func @transform_0(%arg0: i32) -> (i32, i32, i32) {
    %c0_i32 = arith.constant 0 : i32
    %c0_i32_0 = arith.constant 0 : i32
    %c0_i32_1 = arith.constant 0 : i32
    return %arg0, %c0_i32, %c0_i32_0 : i32, i32, i32
  }
  func.func @transform_1(%arg0: i32) -> (i32, i32) {
    %c0_i32 = arith.constant 0 : i32
    %c0_i32_0 = arith.constant 0 : i32
    %c0_i32_1 = arith.constant 0 : i32
    return %c0_i32, %c0_i32_0 : i32, i32
  }
  func.func @transform_2(%arg0: i32) -> (i32, i32) {
    %c0_i32 = arith.constant 0 : i32
    %c0_i32_0 = arith.constant 0 : i32
    %c0_i32_1 = arith.constant 0 : i32
    return %c0_i32, %c0_i32_0 : i32, i32
  }
  func.func @transform_3(%arg0: i32) -> (i32, i32) {
    %c0_i32 = arith.constant 0 : i32
    %c0_i32_0 = arith.constant 0 : i32
    %c0_i32_1 = arith.constant 0 : i32
    return %c0_i32, %c0_i32_0 : i32, i32
  }
  func.func @transform_4(%arg0: i32) -> (i32, i32) {
    %c0_i32 = arith.constant 0 : i32
    %c0_i32_0 = arith.constant 0 : i32
    %c0_i32_1 = arith.constant 0 : i32
    return %c0_i32, %c0_i32_0 : i32, i32
  }
  func.func @transform_5(%arg0: i32) -> (i32, i32, i32) {
    %c0_i32 = arith.constant 0 : i32
    %c0_i32_0 = arith.constant 0 : i32
    %c0_i32_1 = arith.constant 0 : i32
    return %arg0, %c0_i32, %c0_i32_0 : i32, i32, i32
  }
}

</mosaic_0001>

<bundles_post_ra>
// kernel: squeeze_excitation.1
= control target key start
LH: loop header
LB: loop body
LE: loop exit
PB: predicated region body
PF: predicated region fallthrough
CT: control target
= control target key end

     0   :  { %10 = vsyncpa [#allocation3], 0  ;;  %s2465_s0 = inlined_call_operand.hbm [shape: f32[4,128,256], index: 0, kind: input, shape index: {}, may-alias: {0,5}]   ;;  %s2466_s1 = inlined_call_operand.hbm [shape: f32[128,8], index: 1, kind: input, shape index: {}]   ;;  %s2467_s2 = inlined_call_operand.hbm [shape: f32[1,8], index: 2, kind: input, shape index: {}]   ;;  %s2468_s3 = inlined_call_operand.hbm [shape: f32[8,128], index: 3, kind: input, shape index: {}]   ;;  %s2469_s4 = inlined_call_operand.hbm [shape: f32[1,128], index: 4, kind: input, shape index: {}]   ;;  %s2470_s5 = inlined_call_operand.hbm [shape: f32[4,128,256], index: 5, kind: output, shape index: {}, may-alias: {0,5}]  }
   0x1   :  { %11 = vsyncpa [#allocation6], 0 }
   0x2   :  { %12 = vsyncpa [#allocation9], 0 }
   0x3   :  { %13 = vsyncpa [#allocation4], 0  ;;  %s1984_s18 = smov [#allocation5]   ;;  %s1844_s22 = scalar_lea.hbm %s2466_s1, 2048 }
   0x4   :  { %s31_s19 = sshll.u32 %s1984_s18, 4  ;;  %p1845_p0 = scmp.ne.s32.totalorder %s2466_s1, %s1844_s22  ;;  %s32_s19 = int_to_ptr.vmem [resolvable:$true] %s31_s19 }
   0x5   :  { %p1848_p1 = scmp.lt.u32.totalorder %s1844_s22, %s2466_s1 }
   0x7   :  { %p1850_p2 = pnand %p1848_p1, %p1845_p0 }
   0x9   :  { %1853 = shalt.err (!%p1850_p2)
}
   0xa   :  { %s1854_s27 = scalar_lea.vmem %s32_s19, 2048  ;;  %p1859_p4 = scmp.lt.s32.totalorder %s32_s19, %s32_s19 }
   0xb   :  { %p1855_p3 = scmp.ne.s32.totalorder %s32_s19, %s1854_s27  ;;  %p1860_p5 = scmp.lt.s32.totalorder %s1854_s27, %s1854_s27 }
   0xd   :  { %p1861_p6 = por %p1860_p5, %p1859_p4 }
   0xf   :  { %p1862_p7 = pnand %p1861_p6, %p1855_p3 }
  0x11   :  { %1865 = shalt.err (!%p1862_p7)
}
  0x12   :  { %s1985_s28 = smov 128   ;;  %s1986_s29 = smov 8  }
  0x13   :  { %37 = dma.hbm_to_vmem [thread:$0]  %s2466_s1, 2048, %s32_s19, [#allocation6], %s1985_s28, %s1985_s28, %s1986_s29  }
  0x14   :  { %s1987_s7 = smov [#allocation8]   ;;  %s1988_s9 = smov [#allocation2]  }
  0x15   :  { %s54_s8 = sshll.u32 %s1987_s7, 4  ;;  %s19_s10 = sshll.u32 %s1988_s9, 4  ;;  %s55_s8 = int_to_ptr.vmem [resolvable:$true] %s54_s8  ;;  %s20_s10 = int_to_ptr.vmem [resolvable:$true] %s19_s10 }
  0x16   :  { %s1866_s13 = scalar_lea.hbm %s2468_s3, 128 }
  0x17   :  { %p1867_p8 = scmp.ne.s32.totalorder %s2468_s3, %s1866_s13  ;;  %p1870_p9 = scmp.lt.u32.totalorder %s1866_s13, %s2468_s3 }
  0x19   :  { %p1872_p10 = pnand %p1870_p9, %p1867_p8 }
  0x1b   :  { %1875 = shalt.err (!%p1872_p10)
}
  0x1c   :  { %s1876_s1 = scalar_lea.vmem %s55_s8, 128  ;;  %p1881_p12 = scmp.lt.s32.totalorder %s55_s8, %s55_s8 }
  0x1d   :  { %p1877_p11 = scmp.ne.s32.totalorder %s55_s8, %s1876_s1  ;;  %p1882_p13 = scmp.lt.s32.totalorder %s1876_s1, %s1876_s1 }
  0x1f   :  { %p1883_p0 = por %p1882_p13, %p1881_p12 }
  0x21   :  { %p1884_p1 = pnand %p1883_p0, %p1877_p11 }
  0x23   :  { %1887 = shalt.err (!%p1884_p1)
}
  0x24   :  { %57 = dma.hbm_to_vmem [thread:$0]  %s2468_s3, 128, %s55_s8, [#allocation9]  }
  0x25   :  { %s1888_s22 = scalar_lea.hbm %s2465_s0, 16384 }
  0x26   :  { %p1889_p2 = scmp.ne.s32.totalorder %s2465_s0, %s1888_s22  ;;  %p1892_p3 = scmp.lt.u32.totalorder %s1888_s22, %s2465_s0 }
  0x28   :  { %p1894_p4 = pnand %p1892_p3, %p1889_p2 }
  0x2a   :  { %1897 = shalt.err (!%p1894_p4)
}
  0x2b   :  { %s1898_s27 = scalar_lea.vmem %s20_s10, 16384  ;;  %p1903_p6 = scmp.lt.s32.totalorder %s20_s10, %s20_s10 }
  0x2c   :  { %p1899_p5 = scmp.ne.s32.totalorder %s20_s10, %s1898_s27  ;;  %p1904_p7 = scmp.lt.s32.totalorder %s1898_s27, %s1898_s27 }
  0x2e   :  { %p1905_p8 = por %p1904_p7, %p1903_p6 }
  0x30   :  { %p1906_p9 = pnand %p1905_p8, %p1899_p5 }
  0x32   :  { %1909 = shalt.err (!%p1906_p9)
}
  0x33   :  { %s1989_s3 = smov 256   ;;  %s1990_s28 = smov 16  }
  0x34   :  { %25 = dma.hbm_to_vmem [thread:$0]  %s2465_s0, 16384, %s20_s10, [#allocation3], %s1989_s3, %s1989_s3, %s1990_s28  }
  0x35   :  { %s1991_s6 = smov [#allocation7]   ;;  %s1992_s8 = smov [#allocation10]  }
  0x36   :  { %s44_s7 = sshll.u32 %s1991_s6, 4  ;;  %s64_s9 = sshll.u32 %s1992_s8, 4  ;;  %s45_s7 = int_to_ptr.vmem [resolvable:$true] %s44_s7  ;;  %s65_s9 = int_to_ptr.vmem [resolvable:$true] %s64_s9 }
  0x37   :  { %s1910_s13 = scalar_lea.hbm %s2467_s2, 16 }
  0x38   :  { %p1911_p10 = scmp.ne.s32.totalorder %s2467_s2, %s1910_s13  ;;  %p1914_p11 = scmp.lt.u32.totalorder %s1910_s13, %s2467_s2 }
  0x3a   :  { %p1916_p12 = pnand %p1914_p11, %p1911_p10 }
  0x3c   :  { %1919 = shalt.err (!%p1916_p12)
}
  0x3d   :  { %s1920_s0 = scalar_lea.vmem %s45_s7, 16  ;;  %s1924_s10 = scalar_lea.vmem %s45_s7, 32 }
  0x3e   :  { %p1921_p13 = scmp.ne.s32.totalorder %s45_s7, %s1920_s0  ;;  %p1925_p0 = scmp.lt.s32.totalorder %s45_s7, %s45_s7 }
  0x3f   :  { %p1926_p1 = scmp.lt.s32.totalorder %s1924_s10, %s1920_s0 }
  0x41   :  { %p1927_p2 = por %p1926_p1, %p1925_p0 }
  0x43   :  { %p1928_p3 = pnand %p1927_p2, %p1921_p13 }
  0x45   :  { %1931 = shalt.err (!%p1928_p3)
}
  0x46   :  { %47 = dma.hbm_to_vmem [thread:$0]  %s2467_s2, 16, %s45_s7, [#allocation6]  }
  0x47   :  { %s1932_s21 = scalar_lea.hbm %s2469_s4, 16 }
  0x48   :  { %p1933_p4 = scmp.ne.s32.totalorder %s2469_s4, %s1932_s21  ;;  %p1936_p5 = scmp.lt.u32.totalorder %s1932_s21, %s2469_s4 }
  0x4a   :  { %p1938_p6 = pnand %p1936_p5, %p1933_p4 }
  0x4c   :  { %1941 = shalt.err (!%p1938_p6)
}
  0x4d   :  { %s1942_s26 = scalar_lea.vmem %s65_s9, 16  ;;  %s1946_s27 = scalar_lea.vmem %s65_s9, 32 }
  0x4e   :  { %p1943_p7 = scmp.ne.s32.totalorder %s65_s9, %s1942_s26  ;;  %p1947_p8 = scmp.lt.s32.totalorder %s65_s9, %s65_s9 }
  0x4f   :  { %p1948_p9 = scmp.lt.s32.totalorder %s1946_s27, %s1942_s26 }
  0x51   :  { %p1949_p10 = por %p1948_p9, %p1947_p8 }
  0x53   :  { %p1950_p11 = pnand %p1949_p10, %p1943_p7 }
  0x55   :  { %1953 = shalt.err (!%p1950_p11)
}
  0x56   :  { %67 = dma.hbm_to_vmem [thread:$0]  %s2469_s4, 16, %s65_s9, [#allocation9]  }
  0x57   :  { %1976 = dma.done.wait [#allocation3], 16384  }
  0x58   :  { %1977 = vsyncadd [#allocation3], 4294950912 }
  0x59   :  { %1978 = dma.done.wait [#allocation6], 2064  }
  0x5a   :  { %1979 = vsyncadd [#allocation6], 4294965232 }
  0x5b   :  { %1980 = dma.done.wait [#allocation9], 144  }
  0x5c   :  { %1981 = vsyncadd [#allocation9], 4294967152  ;;  %v115_v0 = vld [vmem:[#allocation2 + $0x100] sm:$0xff]  ;;  %v116_v1 = vld [vmem:[#allocation2 + $0x108] sm:$0xff]  ;;  %vm1994_vm0 = vmmov 0   ;;  %vm565_vm1 = vcmask 130112  }
  0x5d   :  { %v83_v2 = vld [vmem:[#allocation2] sm:$0xff]  ;;  %v259_v3 = vadd.f32 %v116_v1, %v115_v0  ;;  %v84_v4 = vld [vmem:[#allocation2 + $0x8] sm:$0xff]  ;;  %v117_v5 = vld [vmem:[#allocation2 + $0x110] sm:$0xff]  ;;  %vm572_vm2 = vcmask 195712   ;;  %vm579_vm3 = vcmask 261312   ;;  %vm586_vm4 = vcmask 326912  }
  0x5e   :  { %v118_v6 = vld [vmem:[#allocation2 + $0x118] sm:$0xff]  ;;  %v211_v7 = vadd.f32 %v84_v4, %v83_v2  ;;  %v85_v8 = vld [vmem:[#allocation2 + $0x10] sm:$0xff]  ;;  %v119_v12 = vld [vmem:[#allocation2 + $0x120] sm:$0xff]  ;;  %vm593_vm5 = vcmask 392512   ;;  %vm600_vm6 = vcmask 458112   ;;  %vm607_vm7 = vcmask 523712  }
  0x5f   :  { %v86_v9 = vld [vmem:[#allocation2 + $0x18] sm:$0xff]  ;;  %260 = vadd.xlane.f32.xlu1 %v259_v3  ;;  %v262_v10 = vadd.f32 %v118_v6, %v117_v5  ;;  %v120_v13 = vld [vmem:[#allocation2 + $0x128] sm:$0xff]  ;;  %v87_v14 = vld [vmem:[#allocation2 + $0x20] sm:$0xff]  ;;  %vm614_vm8 = vcmask 589312   ;;  %vm621_vm9 = vcmask 654912   ;;  %vm628_vm10 = vcmask 720512  }
  0x60   :  { %212 = vadd.xlane.f32.xlu0 %v211_v7  ;;  %v214_v11 = vadd.f32 %v86_v9, %v85_v8  ;;  %v88_v15 = vld [vmem:[#allocation2 + $0x28] sm:$0xff]  ;;  %v265_v16 = vadd.f32 %v120_v13, %v119_v12  ;;  %v149_v18 = vld [vmem:[#allocation2 + $0x210] sm:$0xff]  ;;  %v150_v19 = vld [vmem:[#allocation2 + $0x218] sm:$0xff]  ;;  %vm635_vm11 = vcmask 786112   ;;  %vm642_vm12 = vcmask 851712   ;;  %s1996_s4 = smov [#allocation11]  }
  0x61   :  { %v217_v17 = vadd.f32 %v88_v15, %v87_v14  ;;  %v147_v20 = vld [vmem:[#allocation2 + $0x200] sm:$0xff]  ;;  %v148_v21 = vld [vmem:[#allocation2 + $0x208] sm:$0xff]  ;;  %v310_v22 = vadd.f32 %v150_v19, %v149_v18  ;;  %v121_v24 = vld [vmem:[#allocation2 + $0x130] sm:$0xff]  ;;  %vm649_vm13 = vcmask 917312   ;;  %vm656_vm14 = vcmask 982912   ;;  %s1598_s30 = sshll.u32 %s1996_s4, 4  ;;  %s1599_s30 = int_to_ptr.vmem [resolvable:$true] %s1598_s30 }
  0x62   :  { %v307_v23 = vadd.f32 %v148_v21, %v147_v20  ;;  %v122_v25 = vld [vmem:[#allocation2 + $0x138] sm:$0xff]  ;;  %v89_v26 = vld [vmem:[#allocation2 + $0x30] sm:$0xff]  ;;  %v179_v30 = vld [vmem:[#allocation2 + $0x300] sm:$0xff]  ;;  %vm663_vm15 = vcmask 1048512   ;;  %s1954_s6 = scalar_lea.vmem %s1599_s30, 16384  ;;  %p1959_p13 = scmp.lt.s32.totalorder %s1599_s30, %s1599_s30 }
  0x63   :  { %263 = vadd.xlane.f32.xlu1 %v262_v10  ;;  %v90_v27 = vld [vmem:[#allocation2 + $0x38] sm:$0xff]  ;;  %v268_v28 = vadd.f32 %v122_v25, %v121_v24  ;;  %v180_v31 = vld [vmem:[#allocation2 + $0x308] sm:$0xff]  ;;  %v151_v32 = vld [vmem:[#allocation2 + $0x220] sm:$0xff]  ;;  %p1955_p12 = scmp.ne.s32.totalorder %s1599_s30, %s1954_s6  ;;  %p1960_p0 = scmp.lt.s32.totalorder %s1954_s6, %s1954_s6 }
  0x64   :  { %215 = vadd.xlane.f32.xlu0 %v214_v11  ;;  %v220_v29 = vadd.f32 %v90_v27, %v89_v26  ;;  %v152_v33 = vld [vmem:[#allocation2 + $0x228] sm:$0xff]  ;;  %v355_v34 = vadd.f32 %v180_v31, %v179_v30  ;;  %v91_v36 = vld [vmem:[#allocation2 + $0x40] sm:$0xff]  ;;  %v181_v38 = vld [vmem:[#allocation2 + $0x310] sm:$0xff] }
  0x65   :  { %v313_v35 = vadd.f32 %v152_v33, %v151_v32  ;;  %v92_v37 = vld [vmem:[#allocation2 + $0x48] sm:$0xff]  ;;  %v182_v39 = vld [vmem:[#allocation2 + $0x318] sm:$0xff]  ;;  %v153_v42 = vld [vmem:[#allocation2 + $0x230] sm:$0xff]  ;;  %p1961_p1 = por %p1960_p0, %p1959_p13 }
  0x66   :  { %v223_v40 = vadd.f32 %v92_v37, %v91_v36  ;;  %v358_v41 = vadd.f32 %v182_v39, %v181_v38  ;;  %v154_v43 = vld [vmem:[#allocation2 + $0x238] sm:$0xff]  ;;  %v123_v44 = vld [vmem:[#allocation2 + $0x140] sm:$0xff]  ;;  %v124_v45 = vld [vmem:[#allocation2 + $0x148] sm:$0xff] }
  0x67   :  { %266 = vadd.xlane.f32.xlu1 %v265_v16  ;;  %v316_v46 = vadd.f32 %v154_v43, %v153_v42  ;;  %v271_v47 = vadd.f32 %v124_v45, %v123_v44  ;;  %v93_v48 = vld [vmem:[#allocation2 + $0x50] sm:$0xff]  ;;  %v94_v49 = vld [vmem:[#allocation2 + $0x58] sm:$0xff]  ;;  %v183_v50 = vld [vmem:[#allocation2 + $0x320] sm:$0xff]  ;;  %p1962_p2 = pnand %p1961_p1, %p1955_p12 }
  0x68   :  { %218 = vadd.xlane.f32.xlu0 %v217_v17  ;;  %v184_v51 = vld [vmem:[#allocation2 + $0x328] sm:$0xff]  ;;  %v226_v52 = vadd.f32 %v94_v49, %v93_v48  ;;  %v155_v54 = vld [vmem:[#allocation2 + $0x240] sm:$0xff]  ;;  %v125_v56 = vld [vmem:[#allocation2 + $0x150] sm:$0xff] }
  0x69   :  { %v361_v53 = vadd.f32 %v184_v51, %v183_v50  ;;  %v156_v55 = vld [vmem:[#allocation2 + $0x248] sm:$0xff]  ;;  %v126_v57 = vld [vmem:[#allocation2 + $0x158] sm:$0xff]  ;;  %v95_v60 = vld [vmem:[#allocation2 + $0x60] sm:$0xff] }
  0x6a   :  { %v319_v58 = vadd.f32 %v156_v55, %v155_v54  ;;  %v274_v59 = vadd.f32 %v126_v57, %v125_v56  ;;  %v96_v61 = vld [vmem:[#allocation2 + $0x68] sm:$0xff]  ;;  %v185_v62 = vld [vmem:[#allocation2 + $0x330] sm:$0xff]  ;;  %v186_v63 = vld [vmem:[#allocation2 + $0x338] sm:$0xff] }
  0x6b   :  { %311 = vadd.xlane.f32.xlu1 %v310_v22  ;;  %v229_v0 = vadd.f32 %v96_v61, %v95_v60  ;;  %v364_v1 = vadd.f32 %v186_v63, %v185_v62  ;;  %v157_v2 = vld [vmem:[#allocation2 + $0x250] sm:$0xff]  ;;  %v158_v3 = vld [vmem:[#allocation2 + $0x258] sm:$0xff]  ;;  %v127_v4 = vld [vmem:[#allocation2 + $0x160] sm:$0xff] }
  0x6c   :  { %308 = vadd.xlane.f32.xlu0 %v307_v23  ;;  %v128_v5 = vld [vmem:[#allocation2 + $0x168] sm:$0xff]  ;;  %v322_v6 = vadd.f32 %v158_v3, %v157_v2  ;;  %v97_v8 = vld [vmem:[#allocation2 + $0x70] sm:$0xff]  ;;  %v98_v9 = vld [vmem:[#allocation2 + $0x78] sm:$0xff] }
  0x6d   :  { %v277_v7 = vadd.f32 %v128_v5, %v127_v4  ;;  %v187_v10 = vld [vmem:[#allocation2 + $0x340] sm:$0xff]  ;;  %v188_v11 = vld [vmem:[#allocation2 + $0x348] sm:$0xff]  ;;  %v232_v12 = vadd.f32 %v98_v9, %v97_v8  ;;  %v129_v16 = vld [vmem:[#allocation2 + $0x170] sm:$0xff] }
  0x6e   :  { %v367_v13 = vadd.f32 %v188_v11, %v187_v10  ;;  %v159_v14 = vld [vmem:[#allocation2 + $0x260] sm:$0xff]  ;;  %v160_v15 = vld [vmem:[#allocation2 + $0x268] sm:$0xff]  ;;  %v130_v17 = vld [vmem:[#allocation2 + $0x178] sm:$0xff] }
  0x6f   :  { %269 = vadd.xlane.f32.xlu1 %v268_v28  ;;  %v325_v18 = vadd.f32 %v160_v15, %v159_v14  ;;  %v280_v19 = vadd.f32 %v130_v17, %v129_v16  ;;  %v99_v20 = vld [vmem:[#allocation2 + $0x80] sm:$0xff]  ;;  %v100_v21 = vld [vmem:[#allocation2 + $0x88] sm:$0xff]  ;;  %v189_v22 = vld [vmem:[#allocation2 + $0x350] sm:$0xff] }
  0x70   :  { %221 = vadd.xlane.f32.xlu0 %v220_v29  ;;  %v190_v23 = vld [vmem:[#allocation2 + $0x358] sm:$0xff]  ;;  %v235_v24 = vadd.f32 %v100_v21, %v99_v20  ;;  %v161_v26 = vld [vmem:[#allocation2 + $0x270] sm:$0xff]  ;;  %v131_v28 = vld [vmem:[#allocation2 + $0x180] sm:$0xff] }
  0x71   :  { %v370_v25 = vadd.f32 %v190_v23, %v189_v22  ;;  %v162_v27 = vld [vmem:[#allocation2 + $0x278] sm:$0xff]  ;;  %v132_v29 = vld [vmem:[#allocation2 + $0x188] sm:$0xff]  ;;  %v101_v32 = vld [vmem:[#allocation2 + $0x90] sm:$0xff] }
  0x72   :  { %v328_v30 = vadd.f32 %v162_v27, %v161_v26  ;;  %v283_v31 = vadd.f32 %v132_v29, %v131_v28  ;;  %v102_v33 = vld [vmem:[#allocation2 + $0x98] sm:$0xff]  ;;  %v163_v38 = vld [vmem:[#allocation2 + $0x280] sm:$0xff]  ;;  %v164_v39 = vld [vmem:[#allocation2 + $0x288] sm:$0xff] }
  0x73   :  { %356 = vadd.xlane.f32.xlu1 %v355_v34  ;;  %v191_v34 = vld [vmem:[#allocation2 + $0x360] sm:$0xff]  ;;  %v238_v36 = vadd.f32 %v102_v33, %v101_v32  ;;  %v331_v42 = vadd.f32 %v164_v39, %v163_v38  ;;  %v104_v45 = vld [vmem:[#allocation2 + $0xa8] sm:$0xff]  ;;  %v165_v50 = vld [vmem:[#allocation2 + $0x290] sm:$0xff] }
  0x74   :  { %314 = vadd.xlane.f32.xlu0 %v313_v35  ;;  %v192_v35 = vld [vmem:[#allocation2 + $0x368] sm:$0xff]  ;;  %v103_v44 = vld [vmem:[#allocation2 + $0xa0] sm:$0xff]  ;;  %v166_v51 = vld [vmem:[#allocation2 + $0x298] sm:$0xff] }
  0x75   :  { %v373_v37 = vadd.f32 %v192_v35, %v191_v34  ;;  %v241_v48 = vadd.f32 %v104_v45, %v103_v44  ;;  %v334_v54 = vadd.f32 %v166_v51, %v165_v50  ;;  %v105_v56 = vld [vmem:[#allocation2 + $0xb0] sm:$0xff]  ;;  %v106_v57 = vld [vmem:[#allocation2 + $0xb8] sm:$0xff]  ;;  %v167_v62 = vld [vmem:[#allocation2 + $0x2a0] sm:$0xff] }
  0x76   :  { %v244_v60 = vadd.f32 %v106_v57, %v105_v56  ;;  %v168_v63 = vld [vmem:[#allocation2 + $0x2a8] sm:$0xff]  ;;  %v107_v4 = vld [vmem:[#allocation2 + $0xc0] sm:$0xff]  ;;  %v169_v10 = vld [vmem:[#allocation2 + $0x2b0] sm:$0xff] }
  0x77   :  { %224 = vadd.xlane.f32.xlu1 %v223_v40  ;;  %v133_v40 = vld [vmem:[#allocation2 + $0x190] sm:$0xff]  ;;  %v337_v2 = vadd.f32 %v168_v63, %v167_v62  ;;  %v108_v5 = vld [vmem:[#allocation2 + $0xc8] sm:$0xff]  ;;  %v170_v11 = vld [vmem:[#allocation2 + $0x2b8] sm:$0xff] }
  0x78   :  { %359 = vadd.xlane.f32.xlu0 %v358_v41  ;;  %v134_v41 = vld [vmem:[#allocation2 + $0x198] sm:$0xff]  ;;  %v247_v8 = vadd.f32 %v108_v5, %v107_v4  ;;  %v340_v14 = vadd.f32 %v170_v11, %v169_v10  ;;  %v109_v16 = vld [vmem:[#allocation2 + $0xd0] sm:$0xff]  ;;  %v171_v22 = vld [vmem:[#allocation2 + $0x2c0] sm:$0xff] }
  0x79   :  { %v286_v43 = vadd.f32 %v134_v41, %v133_v40  ;;  %v110_v17 = vld [vmem:[#allocation2 + $0xd8] sm:$0xff]  ;;  %v172_v23 = vld [vmem:[#allocation2 + $0x2c8] sm:$0xff]  ;;  %v111_v28 = vld [vmem:[#allocation2 + $0xe0] sm:$0xff] }
  0x7a   :  { %v250_v20 = vadd.f32 %v110_v17, %v109_v16  ;;  %v343_v26 = vadd.f32 %v172_v23, %v171_v22  ;;  %v112_v29 = vld [vmem:[#allocation2 + $0xe8] sm:$0xff]  ;;  %v173_v34 = vld [vmem:[#allocation2 + $0x2d0] sm:$0xff]  ;;  %v174_v35 = vld [vmem:[#allocation2 + $0x2d8] sm:$0xff] }
  0x7b   :  { %317 = vadd.xlane.f32.xlu1 %v316_v46  ;;  %v193_v46 = vld [vmem:[#allocation2 + $0x370] sm:$0xff]  ;;  %v253_v32 = vadd.f32 %v112_v29, %v111_v28  ;;  %v346_v38 = vadd.f32 %v174_v35, %v173_v34  ;;  %v114_v41 = vld [vmem:[#allocation2 + $0xf8] sm:$0xff]  ;;  %v467_v51 = vld [vmem:[#allocation5] sm:$0xff] }
  0x7c   :  { %272 = vadd.xlane.f32.xlu0 %v271_v47  ;;  %v194_v47 = vld [vmem:[#allocation2 + $0x378] sm:$0xff]  ;;  %v113_v40 = vld [vmem:[#allocation2 + $0xf0] sm:$0xff]  ;;  %v208_v4 = vld [vmem:[#allocation2 + $0x3e8] sm:$0xff] }
  0x7d   :  { %v376_v49 = vadd.f32 %v194_v47, %v193_v46  ;;  %v256_v44 = vadd.f32 %v114_v41, %v113_v40  ;;  %v175_v46 = vld [vmem:[#allocation2 + $0x2e0] sm:$0xff]  ;;  %v176_v47 = vld [vmem:[#allocation2 + $0x2e8] sm:$0xff]  ;;  %v205_v57 = vld [vmem:[#allocation2 + $0x3d0] sm:$0xff] }
  0x7e   :  { %v349_v50 = vadd.f32 %v176_v47, %v175_v46  ;;  %v470_v62 = vld [vmem:[#allocation5 + $0x18] sm:$0xff]  ;;  %v473_v10 = vld [vmem:[#allocation5 + $0x30] sm:$0xff] }
  0x7f   :  { %227 = vadd.xlane.f32.xlu1 %v226_v52  ;;  %v135_v52 = vld [vmem:[#allocation2 + $0x1a0] sm:$0xff]  ;;  %v474_v11 = vld [vmem:[#allocation5 + $0x38] sm:$0xff]  ;;  %v477_v16 = vld [vmem:[#allocation5 + $0x50] sm:$0xff] }
  0x80   :  { %362 = vadd.xlane.f32.xlu0 %v361_v53  ;;  %v136_v53 = vld [vmem:[#allocation2 + $0x1a8] sm:$0xff]  ;;  %v478_v17 = vld [vmem:[#allocation5 + $0x58] sm:$0xff]  ;;  %v481_v22 = vld [vmem:[#allocation5 + $0x70] sm:$0xff] }
  0x81   :  { %v289_v55 = vadd.f32 %v136_v53, %v135_v52  ;;  %v468_v52 = vld [vmem:[#allocation5 + $0x8] sm:$0xff]  ;;  %v482_v23 = vld [vmem:[#allocation5 + $0x78] sm:$0xff] }
  0x82   :  { %v1676_v56 = vpack.c.bf16 %v468_v52, %v467_v51 }
  0x83   :  { %320 = vadd.xlane.f32.xlu1 %v319_v58  ;;  %v195_v58 = vld [vmem:[#allocation2 + $0x380] sm:$0xff] }
  0x84   :  { %275 = vadd.xlane.f32.xlu0 %v274_v59  ;;  %v196_v59 = vld [vmem:[#allocation2 + $0x388] sm:$0xff] }
  0x85   :  { %v379_v61 = vadd.f32 %v196_v59, %v195_v58  ;;  %v206_v58 = vld [vmem:[#allocation2 + $0x3d8] sm:$0xff]  ;;  %v1993_v59 = vmov 0.0|0.0  }
  0x86   :  { %1675 = vmatprep.subr.bf16.mxu0 %v1993_v59  ;;  %v394_v63 = vadd.f32 %v206_v58, %v205_v57 }
  0x87   :  { %230 = vadd.xlane.f32.xlu1 %v229_v0  ;;  %v137_v0 = vld [vmem:[#allocation2 + $0x1b0] sm:$0xff]  ;;  %1677 = vmatpush3.bf16.msra.mxu0 %v1676_v56 }
  0x88   :  { %365 = vadd.xlane.f32.xlu0 %v364_v1  ;;  %v138_v1 = vld [vmem:[#allocation2 + $0x1b8] sm:$0xff]  ;;  %1678 = vmatprep.subr.bf16.mxu0 %v1993_v59 }
  0x89   :  { %v292_v3 = vadd.f32 %v138_v1, %v137_v0  ;;  %v209_v0 = vld [vmem:[#allocation2 + $0x3f0] sm:$0xff]  ;;  %v210_v1 = vld [vmem:[#allocation2 + $0x3f8] sm:$0xff] }
  0x8a   :  { %v400_v5 = vadd.f32 %v210_v1, %v209_v0 }
  0x8b   :  { %323 = vadd.xlane.f32.xlu1 %v322_v6  ;;  %v197_v6 = vld [vmem:[#allocation2 + $0x390] sm:$0xff] }
  0x8c   :  { %278 = vadd.xlane.f32.xlu0 %v277_v7  ;;  %v198_v7 = vld [vmem:[#allocation2 + $0x398] sm:$0xff] }
  0x8d   :  { %v382_v9 = vadd.f32 %v198_v7, %v197_v6  ;;  %v471_v6 = vld [vmem:[#allocation5 + $0x20] sm:$0xff]  ;;  %v472_v7 = vld [vmem:[#allocation5 + $0x28] sm:$0xff] }
  0x8f   :  { %233 = vadd.xlane.f32.xlu1 %v232_v12  ;;  %v139_v12 = vld [vmem:[#allocation2 + $0x1c0] sm:$0xff] }
  0x90   :  { %368 = vadd.xlane.f32.xlu0 %v367_v13  ;;  %v140_v13 = vld [vmem:[#allocation2 + $0x1c8] sm:$0xff] }
  0x91   :  { %v295_v15 = vadd.f32 %v140_v13, %v139_v12  ;;  %v1685_v12 = vpack.c.bf16 %v474_v11, %v473_v10  ;;  %v475_v13 = vld [vmem:[#allocation5 + $0x40] sm:$0xff] }
  0x93   :  { %326 = vadd.xlane.f32.xlu1 %v325_v18  ;;  %v199_v18 = vld [vmem:[#allocation2 + $0x3a0] sm:$0xff] }
  0x94   :  { %281 = vadd.xlane.f32.xlu0 %v280_v19  ;;  %v200_v19 = vld [vmem:[#allocation2 + $0x3a8] sm:$0xff] }
  0x95   :  { %v385_v21 = vadd.f32 %v200_v19, %v199_v18  ;;  %v1691_v18 = vpack.c.bf16 %v478_v17, %v477_v16  ;;  %v479_v19 = vld [vmem:[#allocation5 + $0x60] sm:$0xff] }
  0x97   :  { %236 = vadd.xlane.f32.xlu1 %v235_v24  ;;  %v141_v24 = vld [vmem:[#allocation2 + $0x1d0] sm:$0xff] }
  0x98   :  { %371 = vadd.xlane.f32.xlu0 %v370_v25  ;;  %v142_v25 = vld [vmem:[#allocation2 + $0x1d8] sm:$0xff] }
  0x99   :  { %v298_v27 = vadd.f32 %v142_v25, %v141_v24  ;;  %v1697_v25 = vpack.c.bf16 %v482_v23, %v481_v22 }
  0x9b   :  { %329 = vadd.xlane.f32.xlu1 %v328_v30  ;;  %v201_v30 = vld [vmem:[#allocation2 + $0x3b0] sm:$0xff] }
  0x9c   :  { %284 = vadd.xlane.f32.xlu0 %v283_v31  ;;  %v202_v31 = vld [vmem:[#allocation2 + $0x3b8] sm:$0xff] }
  0x9d   :  { %v388_v33 = vadd.f32 %v202_v31, %v201_v30 }
  0x9f   :  { %239 = vadd.xlane.f32.xlu1 %v238_v36  ;;  %v143_v36 = vld [vmem:[#allocation2 + $0x1e0] sm:$0xff] }
  0xa0   :  { %374 = vadd.xlane.f32.xlu0 %v373_v37  ;;  %v144_v37 = vld [vmem:[#allocation2 + $0x1e8] sm:$0xff] }
  0xa1   :  { %v301_v39 = vadd.f32 %v144_v37, %v143_v36 }
  0xa3   :  { %332 = vadd.xlane.f32.xlu1 %v331_v42  ;;  %v203_v42 = vld [vmem:[#allocation2 + $0x3c0] sm:$0xff] }
  0xa4   :  { %287 = vadd.xlane.f32.xlu0 %v286_v43  ;;  %v204_v43 = vld [vmem:[#allocation2 + $0x3c8] sm:$0xff] }
  0xa5   :  { %v391_v45 = vadd.f32 %v204_v43, %v203_v42 }
  0xa7   :  { %242 = vadd.xlane.f32.xlu1 %v241_v48  ;;  %v145_v48 = vld [vmem:[#allocation2 + $0x1f0] sm:$0xff] }
  0xa8   :  { %377 = vadd.xlane.f32.xlu0 %v376_v49  ;;  %v146_v49 = vld [vmem:[#allocation2 + $0x1f8] sm:$0xff] }
  0xa9   :  { %v304_v53 = vadd.f32 %v146_v49, %v145_v48 }
  0xab   :  { %335 = vadd.xlane.f32.xlu1 %v334_v54  ;;  %v177_v54 = vld [vmem:[#allocation2 + $0x2f0] sm:$0xff] }
  0xac   :  { %290 = vadd.xlane.f32.xlu0 %v289_v55  ;;  %v178_v55 = vld [vmem:[#allocation2 + $0x2f8] sm:$0xff] }
  0xaf   :  { %245 = vadd.xlane.f32.xlu1 %v244_v60  ;;  %v352_v60 = vadd.f32 %v178_v55, %v177_v54 }
  0xb0   :  { %380 = vadd.xlane.f32.xlu0 %v379_v61  ;;  %v469_v61 = vld [vmem:[#allocation5 + $0x10] sm:$0xff] }
  0xb3   :  { %338 = vadd.xlane.f32.xlu1 %v337_v2  ;;  %v1679_v2 = vpack.c.bf16 %v470_v62, %v469_v61 }
  0xb4   :  { %293 = vadd.xlane.f32.xlu0 %v292_v3  ;;  %v207_v3 = vld [vmem:[#allocation2 + $0x3e0] sm:$0xff] }
  0xb5   :  { %1680 = vmatpush3.bf16.msra.mxu0 %v1679_v2 }
  0xb6   :  { %1681 = vmatprep.subr.bf16.mxu0 %v1993_v59 }
  0xb7   :  { %248 = vadd.xlane.f32.xlu1 %v247_v8  ;;  %v397_v8 = vadd.f32 %v208_v4, %v207_v3 }
  0xb8   :  { %383 = vadd.xlane.f32.xlu0 %v382_v9  ;;  %v1682_v9 = vpack.c.bf16 %v472_v7, %v471_v6 }
  0xba   :  { %1683 = vmatpush3.bf16.msra.mxu0 %v1682_v9 }
  0xbb   :  { %341 = vadd.xlane.f32.xlu1 %v340_v14  ;;  %1684 = vmatprep.subr.bf16.mxu0 %v1993_v59  ;;  %v476_v14 = vld [vmem:[#allocation5 + $0x48] sm:$0xff] }
  0xbc   :  { %296 = vadd.xlane.f32.xlu0 %v295_v15  ;;  %v1688_v15 = vpack.c.bf16 %v476_v14, %v475_v13 }
  0xbe   :  { %1686 = vmatpush3.bf16.msra.mxu0 %v1685_v12 }
  0xbf   :  { %251 = vadd.xlane.f32.xlu1 %v250_v20  ;;  %1687 = vmatprep.subr.bf16.mxu0 %v1993_v59  ;;  %v480_v20 = vld [vmem:[#allocation5 + $0x68] sm:$0xff] }
  0xc0   :  { %386 = vadd.xlane.f32.xlu0 %v385_v21  ;;  %v1694_v21 = vpack.c.bf16 %v480_v20, %v479_v19 }
  0xc2   :  { %1689 = vmatpush3.bf16.msra.mxu0 %v1688_v15 }
  0xc3   :  { %344 = vadd.xlane.f32.xlu1 %v343_v26  ;;  %1690 = vmatprep.subr.bf16.mxu0 %v1993_v59 }
  0xc4   :  { %299 = vadd.xlane.f32.xlu0 %v298_v27  ;;  %v1995_v27 = vmov 0.0  }
  0xc5   :  { %1667 = vmatprep.mubr.msk.f32.mxu0 %vm1994_vm0, %v1995_v27  ;;  %1670 = vmatprep.subr.mxu1 %v1995_v27 }
  0xc6   :  { %1692 = vmatpush3.bf16.msra.mxu0 %v1691_v18  ;;  %1672 = vmatprep.mubr.msk.f32.mxu1 %vm1994_vm0, %v1995_v27  ;;  %vm902_vm0 = vcmask 1041409  }
  0xc7   :  { %254 = vadd.xlane.f32.xlu1 %v253_v32  ;;  %1693 = vmatprep.subr.bf16.mxu0 %v1993_v59 }
  0xc8   :  { %389 = vadd.xlane.f32.xlu0 %v388_v33 }
  0xca   :  { %1695 = vmatpush3.bf16.msra.mxu0 %v1694_v21 }
  0xcb   :  { %347 = vadd.xlane.f32.xlu1 %v346_v38  ;;  %1696 = vmatprep.subr.bf16.mxu0 %v1993_v59 }
  0xcc   :  { %302 = vadd.xlane.f32.xlu0 %v301_v39 }
  0xce   :  { %1698 = vmatpush3.bf16.msra.mxu0 %v1697_v25 }
  0xcf   :  { %257 = vadd.xlane.f32.xlu1 %v256_v44 }
  0xd0   :  { %392 = vadd.xlane.f32.xlu0 %v391_v45 }
  0xd3   :  { %350 = vadd.xlane.f32.xlu1 %v349_v50 }
  0xd4   :  { %305 = vadd.xlane.f32.xlu0 %v304_v53 }
  0xd7   :  { %353 = vadd.xlane.f32.xlu1 %v352_v60  ;;  %v554_v60 = vlaneseq }
  0xd8   :  { %395 = vadd.xlane.f32.xlu0 %v394_v63 }
  0xd9   :  { %v555_v63 = vand.u32 127, %v554_v60  ;;  %v2164_v1 = vshrl.u32 %v554_v60, 7 }
  0xdb   :  { %401 = vadd.xlane.f32.xlu1 %v400_v5  ;;  %v560_v3 = vadd.s32 4294967288, %v555_v63  ;;  %v567_v4 = vadd.s32 4294967280, %v555_v63  ;;  %v574_v5 = vadd.s32 4294967272, %v555_v63  ;;  %v581_v6 = vadd.s32 4294967264, %v555_v63 }
  0xdc   :  { %398 = vadd.xlane.f32.xlu0 %v397_v8  ;;  %v588_v7 = vadd.s32 4294967256, %v555_v63  ;;  %v595_v8 = vadd.s32 4294967248, %v555_v63  ;;  %v602_v9 = vadd.s32 4294967240, %v555_v63  ;;  %v609_v10 = vadd.s32 4294967232, %v555_v63 }
  0xdd   :  { %v2171_v12 = vsub.s32 %v555_v63, %v2164_v1  ;;  %v616_v13 = vadd.s32 4294967224, %v555_v63  ;;  %v623_v14 = vadd.s32 4294967216, %v555_v63  ;;  %v630_v16 = vadd.s32 4294967208, %v555_v63 }
  0xde   :  { %v2176_v17 = vsub.s32 %v560_v3, %v2164_v1  ;;  %v2179_v18 = vsub.s32 %v567_v4, %v2164_v1  ;;  %v637_v19 = vadd.s32 4294967200, %v555_v63  ;;  %v2182_v20 = vsub.s32 %v574_v5, %v2164_v1 }
  0xdf   :  { %v2185_v21 = vsub.s32 %v581_v6, %v2164_v1  ;;  %v2188_v22 = vsub.s32 %v588_v7, %v2164_v1  ;;  %v2191_v23 = vsub.s32 %v595_v8, %v2164_v1  ;;  %v2194_v25 = vsub.s32 %v602_v9, %v2164_v1 }
  0xe0   :  { %v2197_v27 = vsub.s32 %v609_v10, %v2164_v1  ;;  %v644_v3 = vadd.s32 4294967192, %v555_v63  ;;  %v651_v4 = vadd.s32 4294967184, %v555_v63  ;;  %v2203_v6 = vsub.s32 %v616_v13, %v2164_v1 }
  0xe1   :  { %v2206_v7 = vsub.s32 %v623_v14, %v2164_v1  ;;  %v2209_v8 = vsub.s32 %v630_v16, %v2164_v1 }
  0xe3   :  { %2478 = vst [vmem:[#allocation18_spill] sm:$0xff] %v2206_v7  ;;  %2479 = vst [vmem:[#allocation19_spill] sm:$0xff] %v2209_v8 }
  0xec   :  { %v2090_v24 = vpop.xlane.xlu1 %260 }
  0xed   :  { %v2092_v26 = vpop.xlane.xlu0 %212  ;;  %v419_v10 = vmul.f32 0.00390625, %v2090_v24 }
  0xee   :  { %v403_v8 = vmul.f32 0.00390625, %v2092_v26 }
  0xef   :  { %v668_v26 = vrot.slane %v419_v10, %v2171_v12 }
  0xf0   :  { %v2094_v28 = vpop.xlane.xlu1 %263 }
  0xf1   :  { %v2096_v29 = vpop.xlane.xlu0 %215  ;;  %v420_v5 = vmul.f32 0.00390625, %v2094_v28  ;;  %v2217_v28 = vsub.s32 %v637_v19, %v2164_v1 }
  0xf3   :  { %2481 = vst [vmem:[#allocation21_spill] sm:$0xff] %v2217_v28 }
  0xf4   :  { %v2098_v30 = vpop.xlane.xlu1 %266 }
  0xf5   :  { %v2100_v31 = vpop.xlane.xlu0 %218 }
  0xf6   :  { %v405_v13 = vmul.f32 0.00390625, %v2100_v31  ;;  %v672_v31 = vrot.slane %v420_v5, %v2176_v17 }
  0xf8   :  { %v2102_v32 = vpop.xlane.xlu1 %311 }
  0xf9   :  { %v2104_v33 = vpop.xlane.xlu0 %308  ;;  %v436_v14 = vmul.f32 0.00390625, %v2102_v32 }
  0xfa   :  { %v435_v7 = vmul.f32 0.00390625, %v2104_v33 }
  0xfc   :  { %v2106_v34 = vpop.xlane.xlu1 %269  ;;  %v747_v5 = vrot.slane %v435_v7, %v2171_v12 }
  0xfd   :  { %v2108_v35 = vpop.xlane.xlu0 %221  ;;  %v422_v16 = vmul.f32 0.00390625, %v2106_v34  ;;  %v658_v34 = vadd.s32 4294967176, %v555_v63 }
  0xfe   :  { %v406_v24 = vmul.f32 0.00390625, %v2108_v35 }
 0x100   :  { %v2110_v36 = vpop.xlane.xlu1 %356  ;;  %v578_v63 = vrot.slane %v406_v24, %v2182_v20 }
 0x101   :  { %v2112_v37 = vpop.xlane.xlu0 %314  ;;  %v451_v10 = vmul.f32 0.00390625, %v2110_v36 }
 0x102   :  { %v437_v32 = vmul.f32 0.00390625, %v2112_v37  ;;  %v682_v37 = vrot.slane %v422_v16, %v2182_v20 }
 0x104   :  { %v2114_v38 = vpop.xlane.xlu1 %224 }
 0x105   :  { %v2116_v39 = vpop.xlane.xlu0 %359  ;;  %v407_v33 = vmul.f32 0.00390625, %v2114_v38  ;;  %v559_v38 = vrot.slane %v403_v8, %v2171_v12 }
 0x108   :  { %v2118_v40 = vpop.xlane.xlu1 %317 }
 0x109   :  { %v2120_v41 = vpop.xlane.xlu0 %272 }
 0x10a   :  { %v423_v7 = vmul.f32 0.00390625, %v2120_v41 }
 0x10c   :  { %v2122_v42 = vpop.xlane.xlu1 %227 }
 0x10d   :  { %v2124_v43 = vpop.xlane.xlu0 %362 }
 0x110   :  { %v2126_v44 = vpop.xlane.xlu1 %320 }
 0x111   :  { %v2128_v45 = vpop.xlane.xlu0 %275 }
 0x114   :  { %v2130_v46 = vpop.xlane.xlu1 %230 }
 0x115   :  { %v2132_v47 = vpop.xlane.xlu0 %365 }
 0x118   :  { %v2134_v48 = vpop.xlane.xlu1 %323 }
 0x119   :  { %v2136_v49 = vpop.xlane.xlu0 %278 }
 0x11c   :  { %v2138_v50 = vpop.xlane.xlu1 %233 }
 0x11d   :  { %v2140_v51 = vpop.xlane.xlu0 %368 }
 0x120   :  { %v2142_v52 = vpop.xlane.xlu1 %326 }
 0x121   :  { %v2144_v53 = vpop.xlane.xlu0 %281 }
 0x124   :  { %v2146_v54 = vpop.xlane.xlu1 %236 }
 0x125   :  { %v2148_v55 = vpop.xlane.xlu0 %371 }
 0x128   :  { %v2150_v56 = vpop.xlane.xlu1 %329 }
 0x129   :  { %v2152_v57 = vpop.xlane.xlu0 %284 }
 0x12c   :  { %v2154_v58 = vpop.xlane.xlu1 %239 }
 0x12d   :  { %v2156_v59 = vpop.xlane.xlu0 %374 }
 0x130   :  { %v2158_v61 = vpop.xlane.xlu1 %332 }
 0x131   :  { %v2160_v62 = vpop.xlane.xlu0 %287 }
 0x134   :  { %v2162_v0 = vpop.xlane.xlu1 %242 }
 0x135   :  { %v2166_v2 = vpop.xlane.xlu0 %377 }
 0x138   :  { %v2168_v11 = vpop.xlane.xlu1 %335 }
 0x139   :  { %v2173_v15 = vpop.xlane.xlu0 %290 }
 0x13a   :  { %2476 = vst [vmem:[#allocation16_spill] sm:$0xff] %v2173_v15  ;;  %v404_v15 = vmul.f32 0.00390625, %v2096_v29  ;;  %v2228_v29 = vsub.s32 %v644_v3, %v2164_v1  ;;  %v452_v3 = vmul.f32 0.00390625, %v2116_v39  ;;  %v673_v39 = vsel %vm565_vm1, %v672_v31, %v668_v26 }
 0x13b   :  { %v826_v26 = vrot.slane %v451_v10, %v2171_v12  ;;  %v424_v12 = vmul.f32 0.00390625, %v2128_v45  ;;  %v410_v10 = vmul.f32 0.00390625, %v2138_v50  ;;  %v441_v45 = vmul.f32 0.00390625, %v2142_v52 }
 0x13c   :  { %v2199_v60 = vpop.xlane.xlu1 %245  ;;  %2482 = vst [vmem:[#allocation22_spill] sm:$0xff] %v2228_v29  ;;  %v564_v35 = vrot.slane %v404_v15, %v2176_v17  ;;  %v438_v15 = vmul.f32 0.00390625, %v2118_v40  ;;  %v830_v36 = vrot.slane %v452_v3, %v2176_v17  ;;  %v2262_v40 = vsub.s32 %v658_v34, %v2164_v1 }
 0x13d   :  { %2477 = vst [vmem:[#allocation17_spill] sm:$0xff] %v2199_v60  ;;  %v2211_v9 = vpop.xlane.xlu0 %380  ;;  %v421_v60 = vmul.f32 0.00390625, %v2098_v30  ;;  %v2231_v30 = vsub.s32 %v651_v4, %v2164_v1  ;;  %v571_v4 = vrot.slane %v405_v13, %v2179_v18  ;;  %v756_v13 = vrot.slane %v437_v32, %v2179_v18 }
 0x13e   :  { %2480 = vst [vmem:[#allocation20_spill] sm:$0xff] %v2211_v9  ;;  %v566_v8 = vsel %vm565_vm1, %v564_v35, %v559_v38  ;;  %v687_v3 = vrot.slane %v423_v7, %v2185_v21  ;;  %v440_v38 = vmul.f32 0.00390625, %v2134_v48  ;;  %v426_v48 = vmul.f32 0.00390625, %v2144_v53 }
 0x13f   :  { %2483 = vst [vmem:[#allocation23_spill] sm:$0xff] %v2231_v30  ;;  %v677_v28 = vrot.slane %v421_v60, %v2179_v18  ;;  %v751_v30 = vrot.slane %v436_v14, %v2176_v17  ;;  %v585_v14 = vrot.slane %v407_v33, %v2185_v21  ;;  %v573_v29 = vsel %vm572_vm2, %v571_v4, %v566_v8 }
 0x140   :  { %v2225_v9 = vpop.xlane.xlu1 %338  ;;  %v408_v33 = vmul.f32 0.00390625, %v2122_v42  ;;  %v580_v41 = vsel %vm579_vm3, %v578_v63, %v573_v29  ;;  %v453_v17 = vmul.f32 0.00390625, %v2124_v43  ;;  %v439_v42 = vmul.f32 0.00390625, %v2126_v44 }
 0x141   :  { %v2236_v19 = vpop.xlane.xlu0 %293  ;;  %v678_v24 = vsel %vm572_vm2, %v677_v28, %v673_v39  ;;  %v752_v31 = vsel %vm565_vm1, %v751_v30, %v747_v5  ;;  %v761_v28 = vrot.slane %v438_v15, %v2182_v20  ;;  %v587_v30 = vsel %vm586_vm4, %v585_v14, %v580_v41 }
 0x142   :  { %v683_v32 = vsel %vm579_vm3, %v682_v37, %v678_v24  ;;  %v757_v35 = vsel %vm572_vm2, %v756_v13, %v752_v31  ;;  %v831_v29 = vsel %vm565_vm1, %v830_v36, %v826_v26  ;;  %v409_v5 = vmul.f32 0.00390625, %v2130_v46 }
 0x143   :  { %v454_v43 = vmul.f32 0.00390625, %v2132_v47  ;;  %v592_v37 = vrot.slane %v408_v33, %v2188_v22  ;;  %v425_v63 = vmul.f32 0.00390625, %v2136_v49  ;;  %v762_v44 = vsel %vm579_vm3, %v761_v28, %v757_v35 }
 0x144   :  { %v2250_v60 = vpop.xlane.xlu1 %248  ;;  %v835_v15 = vrot.slane %v453_v17, %v2179_v18  ;;  %v455_v39 = vmul.f32 0.00390625, %v2140_v51  ;;  %v688_v47 = vsel %vm586_vm4, %v687_v3, %v683_v32  ;;  %v766_v13 = vrot.slane %v439_v42, %v2185_v21 }
 0x145   :  { %v2256_v16 = vpop.xlane.xlu0 %383  ;;  %v411_v49 = vmul.f32 0.00390625, %v2146_v54  ;;  %v692_v50 = vrot.slane %v424_v12, %v2188_v22  ;;  %v599_v18 = vrot.slane %v409_v5, %v2191_v23  ;;  %v840_v51 = vrot.slane %v454_v43, %v2182_v20 }
 0x146   :  { %v456_v52 = vmul.f32 0.00390625, %v2148_v55  ;;  %v594_v7 = vsel %vm593_vm5, %v592_v37, %v587_v30  ;;  %v771_v8 = vrot.slane %v440_v38, %v2188_v22  ;;  %v697_v24 = vrot.slane %v425_v63, %v2191_v23 }
 0x147   :  { %v606_v53 = vrot.slane %v410_v10, %v2194_v25  ;;  %v836_v54 = vsel %vm572_vm2, %v835_v15, %v831_v29  ;;  %v845_v36 = vrot.slane %v455_v39, %v2185_v21  ;;  %v776_v31 = vrot.slane %v441_v45, %v2191_v23 }
 0x148   :  { %v2272_v34 = vpop.xlane.xlu1 %341  ;;  %v442_v32 = vmul.f32 0.00390625, %v2150_v56  ;;  %v767_v55 = vsel %vm586_vm4, %v766_v13, %v762_v44  ;;  %v702_v33 = vrot.slane %v426_v48, %v2194_v25  ;;  %v613_v41 = vrot.slane %v411_v49, %v2197_v27  ;;  %v2484_v13 = vld [vmem:[#allocation16_spill] sm:$0xff]  ;;  %v2485_v49 = vld [vmem:[#allocation17_spill] sm:$0xff] }
 0x149   :  { %v2278_v4 = vpop.xlane.xlu0 %296  ;;  %v427_v26 = vmul.f32 0.00390625, %v2152_v57  ;;  %v693_v17 = vsel %vm593_vm5, %v692_v50, %v688_v47  ;;  %v601_v21 = vsel %vm600_vm6, %v599_v18, %v594_v7  ;;  %v841_v35 = vsel %vm579_vm3, %v840_v51, %v836_v54  ;;  %v2486_v51 = vld [vmem:[#allocation20_spill] sm:$0xff]  ;;  %v2487_v54 = vld [vmem:[#allocation18_spill] sm:$0xff] }
 0x14a   :  { %v850_v56 = vrot.slane %v456_v52, %v2188_v22  ;;  %v772_v30 = vsel %vm593_vm5, %v771_v8, %v767_v55  ;;  %v698_v3 = vsel %vm600_vm6, %v697_v24, %v693_v17  ;;  %v608_v42 = vsel %vm607_vm7, %v606_v53, %v601_v21 }
 0x14b   :  { %v412_v29 = vmul.f32 0.00390625, %v2154_v58  ;;  %v846_v57 = vsel %vm586_vm4, %v845_v36, %v841_v35  ;;  %v777_v12 = vsel %vm600_vm6, %v776_v31, %v772_v30  ;;  %v781_v5 = vrot.slane %v442_v32, %v2194_v25  ;;  %v2489_v35 = vld [vmem:[#allocation21_spill] sm:$0xff] }
 0x14c   :  { %v2292_v46 = vpop.xlane.xlu1 %251  ;;  %v457_v43 = vmul.f32 0.00390625, %v2156_v59  ;;  %v703_v22 = vsel %vm607_vm7, %v702_v33, %v698_v3  ;;  %v615_v38 = vsel %vm614_vm8, %v613_v41, %v608_v42  ;;  %v707_v63 = vrot.slane %v427_v26, %v2197_v27  ;;  %v2488_v33 = vld [vmem:[#allocation19_spill] sm:$0xff] }
 0x14d   :  { %v2298_v14 = vpop.xlane.xlu0 %386  ;;  %v443_v58 = vmul.f32 0.00390625, %v2158_v61  ;;  %v851_v44 = vsel %vm593_vm5, %v850_v56, %v846_v57  ;;  %v428_v15 = vmul.f32 0.00390625, %v2160_v62  ;;  %v413_v39 = vmul.f32 0.00390625, %v2162_v0 }
 0x14e   :  { %v458_v59 = vmul.f32 0.00390625, %v2166_v2  ;;  %v620_v45 = vrot.slane %v412_v29, %v2203_v6  ;;  %v444_v47 = vmul.f32 0.00390625, %v2168_v11  ;;  %v429_v48 = vmul.f32 0.00390625, %v2484_v13 }
 0x14f   :  { %v414_v50 = vmul.f32 0.00390625, %v2485_v49  ;;  %v782_v61 = vsel %vm607_vm7, %v781_v5, %v777_v12  ;;  %v855_v18 = vrot.slane %v457_v43, %v2191_v23  ;;  %v459_v52 = vmul.f32 0.00390625, %v2486_v51 }
 0x150   :  { %v2312_v20 = vpop.xlane.xlu1 %344  ;;  %v445_v62 = vmul.f32 0.00390625, %v2225_v9  ;;  %v708_v2 = vsel %vm614_vm8, %v707_v63, %v703_v22  ;;  %v786_v7 = vrot.slane %v443_v58, %v2197_v27  ;;  %v430_v8 = vmul.f32 0.00390625, %v2236_v19 }
 0x151   :  { %v2318_v28 = vpop.xlane.xlu0 %299  ;;  %v415_v11 = vmul.f32 0.00390625, %v2250_v60  ;;  %v712_v53 = vrot.slane %v428_v15, %v2203_v6  ;;  %v627_v36 = vrot.slane %v413_v39, %v2487_v54  ;;  %v860_v23 = vrot.slane %v458_v59, %v2194_v25 }
 0x152   :  { %v460_v31 = vmul.f32 0.00390625, %v2256_v16  ;;  %v622_v9 = vsel %vm621_vm9, %v620_v45, %v615_v38  ;;  %v791_v32 = vrot.slane %v444_v47, %v2203_v6  ;;  %v717_v55 = vrot.slane %v429_v48, %v2487_v54  ;;  %v2490_v48 = vld [vmem:[#allocation22_spill] sm:$0xff] }
 0x153   :  { %v634_v41 = vrot.slane %v414_v50, %v2488_v33  ;;  %v856_v19 = vsel %vm600_vm6, %v855_v18, %v851_v44  ;;  %v865_v60 = vrot.slane %v459_v52, %v2197_v27  ;;  %v796_v26 = vrot.slane %v445_v62, %v2487_v54 }
 0x154   :  { %v2332_v37 = vpop.xlane.xlu1 %254  ;;  %v446_v17 = vmul.f32 0.00390625, %v2272_v34  ;;  %v787_v16 = vsel %vm614_vm8, %v786_v7, %v782_v61  ;;  %v722_v21 = vrot.slane %v430_v8, %v2488_v33  ;;  %v641_v56 = vrot.slane %v415_v11, %v2489_v35 }
 0x155   :  { %v2338_v10 = vpop.xlane.xlu0 %389  ;;  %v431_v30 = vmul.f32 0.00390625, %v2278_v4  ;;  %v713_v42 = vsel %vm621_vm9, %v712_v53, %v708_v2  ;;  %v629_v29 = vsel %vm628_vm10, %v627_v36, %v622_v9  ;;  %v861_v27 = vsel %vm607_vm7, %v860_v23, %v856_v19 }
 0x156   :  { %v870_v57 = vrot.slane %v460_v31, %v2203_v6  ;;  %v792_v34 = vsel %vm621_vm9, %v791_v32, %v787_v16  ;;  %v718_v12 = vsel %vm628_vm10, %v717_v55, %v713_v42  ;;  %v636_v5 = vsel %vm635_vm11, %v634_v41, %v629_v29 }
 0x157   :  { %v416_v43 = vmul.f32 0.00390625, %v2292_v46  ;;  %v866_v22 = vsel %vm614_vm8, %v865_v60, %v861_v27  ;;  %v797_v4 = vsel %vm628_vm10, %v796_v26, %v792_v34  ;;  %v801_v38 = vrot.slane %v446_v17, %v2488_v33 }
 0x158   :  { %v348_v0 = vpop.xlane.xlu1 %347  ;;  %v447_v63 = vmul.f32 0.00390625, %v2312_v20  ;;  %v723_v44 = vsel %vm635_vm11, %v722_v21, %v718_v12  ;;  %v643_v6 = vsel %vm642_vm12, %v641_v56, %v636_v5  ;;  %v727_v15 = vrot.slane %v431_v30, %v2489_v35 }
 0x159   :  { %v303_v24 = vpop.xlane.xlu0 %302  ;;  %v432_v39 = vmul.f32 0.00390625, %v2318_v28  ;;  %v871_v46 = vsel %vm621_vm9, %v870_v57, %v866_v22  ;;  %v461_v45 = vmul.f32 0.00390625, %v2298_v14  ;;  %v448_v47 = vmul.f32 0.00390625, %v348_v0 }
 0x15a   :  { %v433_v13 = vmul.f32 0.00390625, %v303_v24  ;;  %v648_v20 = vrot.slane %v416_v43, %v2490_v48  ;;  %v462_v49 = vmul.f32 0.00390625, %v2338_v10  ;;  %v802_v18 = vsel %vm635_vm11, %v801_v38, %v797_v4  ;;  %v2491_v24 = vld [vmem:[#allocation23_spill] sm:$0xff] }
 0x15b   :  { %v806_v28 = vrot.slane %v447_v63, %v2489_v35  ;;  %v417_v51 = vmul.f32 0.00390625, %v2332_v37  ;;  %vm904_vm1 = vcmask 1042434   ;;  %v728_v14 = vsel %vm642_vm12, %v727_v15, %v723_v44  ;;  %v1612_v44 = vld [vmem:[#allocation7] ss:$0 sm:$0xff] }
 0x15c   :  { %v258_v25 = vpop.xlane.xlu1 %257  ;;  %v732_v0 = vrot.slane %v432_v39, %v2490_v48  ;;  %v875_v10 = vrot.slane %v461_v45, %v2487_v54  ;;  %v811_v11 = vrot.slane %v448_v47, %v2490_v48  ;;  %v737_v53 = vrot.slane %v433_v13, %v2491_v24 }
 0x15d   :  { %v393_v3 = vpop.xlane.xlu0 %392  ;;  %v418_v2 = vmul.f32 0.00390625, %v258_v25  ;;  %v650_v23 = vsel %vm649_vm13, %v648_v20, %v643_v6  ;;  %v880_v37 = vrot.slane %v462_v49, %v2488_v33  ;;  %v807_v32 = vsel %vm642_vm12, %v806_v28, %v802_v18 }
 0x15e   :  { %v463_v52 = vmul.f32 0.00390625, %v393_v3  ;;  %v655_v55 = vrot.slane %v417_v51, %v2491_v24  ;;  %v733_v60 = vsel %vm649_vm13, %v732_v0, %v728_v14  ;;  %v876_v16 = vsel %vm628_vm10, %v875_v10, %v871_v46  ;;  %v1613_v46 = vld [vmem:[#allocation10] ss:$0 sm:$0xff] }
 0x15f   :  { %v662_v26 = vrot.slane %v418_v2, %v2262_v40  ;;  %v812_v21 = vsel %vm649_vm13, %v811_v11, %v807_v32  ;;  %v738_v56 = vsel %vm656_vm14, %v737_v53, %v733_v60  ;;  %vm906_vm2 = vcmask 1043459   ;;  %v1717_v11 = vld [vmem:[#allocation2 + $0x18] sm:$0xff]  ;;  %v1718_v53 = vld [vmem:[#allocation2] sm:$0xff] }
 0x160   :  { %v351_v58 = vpop.xlane.xlu1 %350  ;;  %v885_v41 = vrot.slane %v463_v52, %v2489_v35  ;;  %v881_v35 = vsel %vm635_vm11, %v880_v37, %v876_v16  ;;  %v657_v27 = vsel %vm656_vm14, %v655_v55, %v650_v23  ;;  %vm988_vm3 = vcmask 64512   ;;  %v1719_v23 = vld [vmem:[#allocation2 + $0x8] sm:$0xff]  ;;  %v1720_v32 = vld [vmem:[#allocation2 + $0x20] sm:$0xff]  ;;  %v1724_v16 = vld [vmem:[#allocation2 + $0x30] sm:$0xff] }
 0x161   :  { %v306_v59 = vpop.xlane.xlu0 %305  ;;  %v449_v50 = vmul.f32 0.00390625, %v351_v58  ;;  %v664_v5 = vsel %vm663_vm15, %v662_v26, %v657_v27  ;;  %v980_v58 = vld [vmem:[#allocation8] sm:$0xff]  ;;  %v1138_v51 = vsub.s32 1, %v2164_v1  ;;  %v1272_v0 = vsub.s32 3, %v2164_v1 }
 0x162   :  { %v434_v61 = vmul.f32 0.00390625, %v306_v59  ;;  %v886_v57 = vsel %vm642_vm12, %v885_v41, %v881_v35  ;;  %1671 = vmatpush3.msra.mxu1 %v980_v58  ;;  %v1721_v41 = vld [vmem:[#allocation2 + $0x28] sm:$0xff]  ;;  %v1726_v35 = vld [vmem:[#allocation2 + $0x60] sm:$0xff] }
 0x163   :  { %v816_v31 = vrot.slane %v449_v50, %v2491_v24  ;;  %v1071_v50 = vsub.s32 0, %v2164_v1  ;;  %v1723_v26 = vld [vmem:[#allocation2 + $0x48] sm:$0xff] }
 0x164   :  { %v354_v62 = vpop.xlane.xlu1 %353  ;;  %v742_v9 = vrot.slane %v434_v61, %v2262_v40 }
 0x165   :  { %v450_v7 = vmul.f32 0.00390625, %v354_v62  ;;  %v396_v8 = vpop.xlane.xlu0 %395  ;;  %v817_v3 = vsel %vm656_vm14, %v816_v31, %v812_v21  ;;  %v1205_v62 = vsub.s32 2, %v2164_v1 }
 0x166   :  { %v464_v36 = vmul.f32 0.00390625, %v396_v8  ;;  %v743_v42 = vsel %vm663_vm15, %v742_v9, %v738_v56  ;;  %v1716_v8 = vld [vmem:[#allocation2 + $0x10] sm:$0xff]  ;;  %v1725_v56 = vld [vmem:[#allocation2 + $0x38] sm:$0xff] }
 0x167   :  { %v821_v54 = vrot.slane %v450_v7, %v2262_v40  ;;  %v903_v4 = vsel %vm902_vm0, %v743_v42, %v664_v5  ;;  %v1727_v42 = vld [vmem:[#allocation2 + $0x68] sm:$0xff]  ;;  %v1729_v5 = vld [vmem:[#allocation2 + $0x58] sm:$0xff] }
 0x168   :  { %v402_v19 = vpop.xlane.xlu1 %401  ;;  %v890_v17 = vrot.slane %v464_v36, %v2490_v48 }
 0x169   :  { %v399_v33 = vpop.xlane.xlu0 %398  ;;  %v466_v25 = vmul.f32 0.00390625, %v402_v19  ;;  %v822_v12 = vsel %vm663_vm15, %v821_v54, %v817_v3  ;;  %v1722_v19 = vld [vmem:[#allocation2 + $0x40] sm:$0xff] }
 0x16a   :  { %v465_v30 = vmul.f32 0.00390625, %v399_v33  ;;  %v891_v43 = vsel %vm649_vm13, %v890_v17, %v886_v57 }
 0x16b   :  { %v900_v29 = vrot.slane %v466_v25, %v2262_v40  ;;  %v905_v40 = vsel %vm904_vm1, %v822_v12, %v903_v4 }
 0x16c   :  { %v895_v34 = vrot.slane %v465_v30, %v2491_v24 }
 0x16e   :  { %v896_v22 = vsel %vm656_vm14, %v895_v34, %v891_v43  ;;  %v1728_v34 = vld [vmem:[#allocation2 + $0x50] sm:$0xff] }
 0x16f   :  { %v901_v38 = vsel %vm663_vm15, %v900_v29, %v896_v22  ;;  %v1730_v22 = vld [vmem:[#allocation2 + $0x80] sm:$0xff] }
 0x170   :  { %v907_v63 = vsel %vm906_vm2, %v901_v38, %v905_v40  ;;  %v1731_v38 = vld [vmem:[#allocation2 + $0x88] sm:$0xff] }
 0x171   :  { %1668 = vmatmul.mubr.f32.vlgmr.msra.gmra.mrb[0].mxu0 %v907_v63 }
 0x244   :  { %v975_v6 = vpop.f32.mrb[0].mxu0 }
 0x245   :  { %v976_v15 = vadd.f32 %v1612_v44, %v975_v6  ;;  %v1669_v39 = vpop.f32.mrb[1].mxu0  ;;  %v1732_v44 = vld [vmem:[#allocation2 + $0x70] sm:$0xff] }
 0x247   :  { %v979_v59 = vmax.f32 %v976_v15, 0.0  ;;  %v1733_v15 = vld [vmem:[#allocation2 + $0x78] sm:$0xff] }
 0x249   :  { %1673 = vmatmul.mubr.msk.f32.vlgmr.msra.gmra.mrb[0].mxu1 %vm988_vm3, %v979_v59  ;;  %v1734_v59 = vld [vmem:[#allocation2 + $0xa0] sm:$0xff] }
 0x31c   :  { %v1058_v45 = vpop.f32.mrb[0].mxu1 }
 0x31d   :  { %v1059_v47 = vadd.f32 %v1613_v46, %v1058_v45  ;;  %v1674_v13 = vpop.f32.mrb[1].mxu1  ;;  %v1735_v45 = vld [vmem:[#allocation2 + $0xa8] sm:$0xff] }
 0x31f   :  { %v1615_v48 = vmul.f32 -1.442695, %v1059_v47 }
 0x321   :  { %1712 = vpow2.f32 %v1615_v48 }
 0x32b   :  { %v1713_v20 = vpop.eup %1712 }
 0x32c   :  { %v1065_v49 = vadd.f32 1.0, %v1713_v20  ;;  %v1736_v20 = vld [vmem:[#allocation2 + $0x90] sm:$0xff] }
 0x32e   :  { %1714 = vrcp.f32 %v1065_v49 }
 0x338   :  { %v1715_v61 = vpop.eup %1714 }
 0x339   :  { %v1068_v18 = vadd.f32 1.0, %v1715_v61 }
 0x33b   :  { %v1072_v28 = vrot.slane %v1068_v18, %v1071_v50  ;;  %v1139_v52 = vrot.slane %v1068_v18, %v1138_v51  ;;  %v1206_v14 = vrot.slane %v1068_v18, %v1205_v62  ;;  %v2432_v2 = vrot.slane %v1068_v18, %v1272_v0  ;;  %v1737_v50 = vld [vmem:[#allocation2 + $0x98] sm:$0xff]  ;;  %v1738_v18 = vld [vmem:[#allocation2 + $0xc0] sm:$0xff]  ;;  %v1739_v51 = vld [vmem:[#allocation2 + $0xc8] sm:$0xff] }
 0x33c   :  { %v1740_v0 = vld [vmem:[#allocation2 + $0xb0] sm:$0xff] }
 0x33d   :  { %1078 = vbcast.lane.b32.xlu1 %v1072_v28, 264  ;;  %1074 = vbcast.lane.b32.xlu0 %v1072_v28, 256 }
 0x341   :  { %1082 = vbcast.lane.b32.xlu1 %v1072_v28, 272  ;;  %1090 = vbcast.lane.b32.xlu0 %v1072_v28, 288 }
 0x345   :  { %1086 = vbcast.lane.b32.xlu1 %v1072_v28, 280  ;;  %1098 = vbcast.lane.b32.xlu0 %v1072_v28, 304 }
 0x349   :  { %1094 = vbcast.lane.b32.xlu1 %v1072_v28, 296  ;;  %1106 = vbcast.lane.b32.xlu0 %v1072_v28, 320 }
 0x34d   :  { %1102 = vbcast.lane.b32.xlu1 %v1072_v28, 312  ;;  %1114 = vbcast.lane.b32.xlu0 %v1072_v28, 336 }
 0x351   :  { %1110 = vbcast.lane.b32.xlu1 %v1072_v28, 328  ;;  %1122 = vbcast.lane.b32.xlu0 %v1072_v28, 352 }
 0x355   :  { %1118 = vbcast.lane.b32.xlu1 %v1072_v28, 344  ;;  %1130 = vbcast.lane.b32.xlu0 %v1072_v28, 368 }
 0x359   :  { %1126 = vbcast.lane.b32.xlu1 %v1072_v28, 360  ;;  %1141 = vbcast.lane.b32.xlu0 %v1139_v52, 256 }
 0x35d   :  { %1134 = vbcast.lane.b32.xlu1 %v1072_v28, 376  ;;  %1149 = vbcast.lane.b32.xlu0 %v1139_v52, 272 }
 0x361   :  { %1145 = vbcast.lane.b32.xlu1 %v1139_v52, 264  ;;  %1157 = vbcast.lane.b32.xlu0 %v1139_v52, 288 }
 0x365   :  { %1153 = vbcast.lane.b32.xlu1 %v1139_v52, 280  ;;  %1165 = vbcast.lane.b32.xlu0 %v1139_v52, 304 }
 0x369   :  { %1161 = vbcast.lane.b32.xlu1 %v1139_v52, 296  ;;  %1173 = vbcast.lane.b32.xlu0 %v1139_v52, 320 }
 0x36d   :  { %1169 = vbcast.lane.b32.xlu1 %v1139_v52, 312  ;;  %1181 = vbcast.lane.b32.xlu0 %v1139_v52, 336 }
 0x371   :  { %1177 = vbcast.lane.b32.xlu1 %v1139_v52, 328  ;;  %1189 = vbcast.lane.b32.xlu0 %v1139_v52, 352 }
 0x375   :  { %1185 = vbcast.lane.b32.xlu1 %v1139_v52, 344  ;;  %1197 = vbcast.lane.b32.xlu0 %v1139_v52, 368 }
 0x379   :  { %1193 = vbcast.lane.b32.xlu1 %v1139_v52, 360  ;;  %1208 = vbcast.lane.b32.xlu0 %v1206_v14, 256 }
 0x37d   :  { %1201 = vbcast.lane.b32.xlu1 %v1139_v52, 376  ;;  %1216 = vbcast.lane.b32.xlu0 %v1206_v14, 272 }
 0x381   :  { %1212 = vbcast.lane.b32.xlu1 %v1206_v14, 264  ;;  %1224 = vbcast.lane.b32.xlu0 %v1206_v14, 288 }
 0x385   :  { %1220 = vbcast.lane.b32.xlu1 %v1206_v14, 280  ;;  %1232 = vbcast.lane.b32.xlu0 %v1206_v14, 304 }
 0x389   :  { %1228 = vbcast.lane.b32.xlu1 %v1206_v14, 296  ;;  %1240 = vbcast.lane.b32.xlu0 %v1206_v14, 320 }
 0x38d   :  { %1236 = vbcast.lane.b32.xlu1 %v1206_v14, 312  ;;  %1248 = vbcast.lane.b32.xlu0 %v1206_v14, 336 }
 0x391   :  { %1244 = vbcast.lane.b32.xlu1 %v1206_v14, 328  ;;  %1256 = vbcast.lane.b32.xlu0 %v1206_v14, 352 }
 0x395   :  { %1252 = vbcast.lane.b32.xlu1 %v1206_v14, 344  ;;  %1264 = vbcast.lane.b32.xlu0 %v1206_v14, 368 }
 0x399   :  { %1260 = vbcast.lane.b32.xlu1 %v1206_v14, 360  ;;  %1275 = vbcast.lane.b32.xlu0 %v2432_v2, 256 }
 0x39d   :  { %1268 = vbcast.lane.b32.xlu1 %v1206_v14, 376  ;;  %1283 = vbcast.lane.b32.xlu0 %v2432_v2, 272 }
 0x3a1   :  { %1279 = vbcast.lane.b32.xlu1 %v2432_v2, 264  ;;  %1291 = vbcast.lane.b32.xlu0 %v2432_v2, 288 }
 0x3a5   :  { %1287 = vbcast.lane.b32.xlu1 %v2432_v2, 280  ;;  %1299 = vbcast.lane.b32.xlu0 %v2432_v2, 304 }
 0x3a9   :  { %1295 = vbcast.lane.b32.xlu1 %v2432_v2, 296  ;;  %1307 = vbcast.lane.b32.xlu0 %v2432_v2, 320 }
 0x3ad   :  { %1303 = vbcast.lane.b32.xlu1 %v2432_v2, 312  ;;  %1315 = vbcast.lane.b32.xlu0 %v2432_v2, 336 }
 0x3af   :  { %v1079_v1 = vpop.permute.xlu1 %1078  ;;  %v1075_v7 = vpop.permute.xlu0 %1074 }
 0x3b0   :  { %v1339_v10 = vmul.f32 %v1716_v8, %v1079_v1  ;;  %v1340_v24 = vmul.f32 %v1717_v11, %v1079_v1  ;;  %v1337_v36 = vmul.f32 %v1718_v53, %v1075_v7  ;;  %v1338_v37 = vmul.f32 %v1719_v23, %v1075_v7  ;;  %v1741_v1 = vld [vmem:[#allocation2 + $0xb8] sm:$0xff]  ;;  %v1742_v8 = vld [vmem:[#allocation2 + $0xe0] sm:$0xff]  ;;  %v1743_v11 = vld [vmem:[#allocation2 + $0xe8] sm:$0xff] }
 0x3b1   :  { %1311 = vbcast.lane.b32.xlu1 %v2432_v2, 328  ;;  %1323 = vbcast.lane.b32.xlu0 %v2432_v2, 352  ;;  %v1744_v23 = vld [vmem:[#allocation2 + $0xd0] sm:$0xff] }
 0x3b2   :  { %1467 = vst [vmem:[#allocation11 + $0x10] sm:$0xff] %v1339_v10  ;;  %1468 = vst [vmem:[#allocation11 + $0x18] sm:$0xff] %v1340_v24 }
 0x3b3   :  { %1465 = vst [vmem:[#allocation11] sm:$0xff] %v1337_v36  ;;  %1466 = vst [vmem:[#allocation11 + $0x8] sm:$0xff] %v1338_v37  ;;  %v1083_v31 = vpop.permute.xlu1 %1082  ;;  %v1091_v9 = vpop.permute.xlu0 %1090 }
 0x3b4   :  { %v1341_v55 = vmul.f32 %v1720_v32, %v1083_v31  ;;  %v1342_v54 = vmul.f32 %v1721_v41, %v1083_v31  ;;  %v1345_v60 = vmul.f32 %v1722_v19, %v1091_v9  ;;  %v1346_v17 = vmul.f32 %v1723_v26, %v1091_v9  ;;  %v1745_v31 = vld [vmem:[#allocation2 + $0xd8] sm:$0xff]  ;;  %v1746_v32 = vld [vmem:[#allocation2 + $0x100] sm:$0xff]  ;;  %v1747_v41 = vld [vmem:[#allocation2 + $0x108] sm:$0xff] }
 0x3b5   :  { %1319 = vbcast.lane.b32.xlu1 %v2432_v2, 344  ;;  %1331 = vbcast.lane.b32.xlu0 %v2432_v2, 368  ;;  %v1748_v26 = vld [vmem:[#allocation2 + $0xf0] sm:$0xff] }
 0x3b6   :  { %1469 = vst [vmem:[#allocation11 + $0x20] sm:$0xff] %v1341_v55  ;;  %1470 = vst [vmem:[#allocation11 + $0x28] sm:$0xff] %v1342_v54 }
 0x3b7   :  { %1473 = vst [vmem:[#allocation11 + $0x40] sm:$0xff] %v1345_v60  ;;  %1474 = vst [vmem:[#allocation11 + $0x48] sm:$0xff] %v1346_v17  ;;  %v1087_v33 = vpop.permute.xlu1 %1086  ;;  %v1099_v25 = vpop.permute.xlu0 %1098 }
 0x3b8   :  { %v1343_v21 = vmul.f32 %v1724_v16, %v1087_v33  ;;  %v1344_v30 = vmul.f32 %v1725_v56, %v1087_v33  ;;  %v1349_v3 = vmul.f32 %v1726_v35, %v1099_v25  ;;  %v1350_v29 = vmul.f32 %v1727_v42, %v1099_v25  ;;  %v1749_v33 = vld [vmem:[#allocation2 + $0xf8] sm:$0xff]  ;;  %v1750_v16 = vld [vmem:[#allocation2 + $0x120] sm:$0xff]  ;;  %v1751_v56 = vld [vmem:[#allocation2 + $0x128] sm:$0xff] }
 0x3b9   :  { %1327 = vbcast.lane.b32.xlu1 %v2432_v2, 360  ;;  %v1752_v42 = vld [vmem:[#allocation2 + $0x110] sm:$0xff] }
 0x3ba   :  { %1471 = vst [vmem:[#allocation11 + $0x30] sm:$0xff] %v1343_v21  ;;  %1472 = vst [vmem:[#allocation11 + $0x38] sm:$0xff] %v1344_v30 }
 0x3bb   :  { %1477 = vst [vmem:[#allocation11 + $0x60] sm:$0xff] %v1349_v3  ;;  %1478 = vst [vmem:[#allocation11 + $0x68] sm:$0xff] %v1350_v29  ;;  %v1095_v27 = vpop.permute.xlu1 %1094  ;;  %v1107_v57 = vpop.permute.xlu0 %1106 }
 0x3bc   :  { %v1347_v12 = vmul.f32 %v1728_v34, %v1095_v27  ;;  %v1348_v43 = vmul.f32 %v1729_v5, %v1095_v27  ;;  %v1353_v4 = vmul.f32 %v1730_v22, %v1107_v57  ;;  %v1354_v40 = vmul.f32 %v1731_v38, %v1107_v57  ;;  %v1753_v27 = vld [vmem:[#allocation2 + $0x118] sm:$0xff]  ;;  %v1754_v34 = vld [vmem:[#allocation2 + $0x140] sm:$0xff]  ;;  %v1755_v5 = vld [vmem:[#allocation2 + $0x148] sm:$0xff] }
 0x3bd   :  { %1335 = vbcast.lane.b32.xlu1 %v2432_v2, 376  ;;  %v1756_v38 = vld [vmem:[#allocation2 + $0x130] sm:$0xff] }
 0x3be   :  { %1475 = vst [vmem:[#allocation11 + $0x50] sm:$0xff] %v1347_v12  ;;  %1476 = vst [vmem:[#allocation11 + $0x58] sm:$0xff] %v1348_v43 }
 0x3bf   :  { %1481 = vst [vmem:[#allocation11 + $0x80] sm:$0xff] %v1353_v4  ;;  %1482 = vst [vmem:[#allocation11 + $0x88] sm:$0xff] %v1354_v40  ;;  %v1103_v63 = vpop.permute.xlu1 %1102  ;;  %v1115_v58 = vpop.permute.xlu0 %1114 }
 0x3c0   :  { %v1351_v6 = vmul.f32 %v1732_v44, %v1103_v63  ;;  %v1352_v39 = vmul.f32 %v1733_v15, %v1103_v63  ;;  %v1357_v46 = vmul.f32 %v1734_v59, %v1115_v58  ;;  %v1358_v47 = vmul.f32 %v1735_v45, %v1115_v58  ;;  %v1757_v63 = vld [vmem:[#allocation2 + $0x138] sm:$0xff]  ;;  %v1758_v44 = vld [vmem:[#allocation2 + $0x160] sm:$0xff]  ;;  %v1759_v15 = vld [vmem:[#allocation2 + $0x168] sm:$0xff] }
 0x3c1   :  { %v1760_v45 = vld [vmem:[#allocation2 + $0x150] sm:$0xff] }
 0x3c2   :  { %1479 = vst [vmem:[#allocation11 + $0x70] sm:$0xff] %v1351_v6  ;;  %1480 = vst [vmem:[#allocation11 + $0x78] sm:$0xff] %v1352_v39 }
 0x3c3   :  { %1485 = vst [vmem:[#allocation11 + $0xa0] sm:$0xff] %v1357_v46  ;;  %1486 = vst [vmem:[#allocation11 + $0xa8] sm:$0xff] %v1358_v47  ;;  %v1111_v13 = vpop.permute.xlu1 %1110  ;;  %v1123_v48 = vpop.permute.xlu0 %1122 }
 0x3c4   :  { %v1355_v49 = vmul.f32 %v1736_v20, %v1111_v13  ;;  %v1356_v61 = vmul.f32 %v1737_v50, %v1111_v13  ;;  %v1361_v28 = vmul.f32 %v1738_v18, %v1123_v48  ;;  %v1362_v52 = vmul.f32 %v1739_v51, %v1123_v48  ;;  %v1761_v13 = vld [vmem:[#allocation2 + $0x158] sm:$0xff]  ;;  %v1762_v20 = vld [vmem:[#allocation2 + $0x180] sm:$0xff]  ;;  %v1763_v50 = vld [vmem:[#allocation2 + $0x188] sm:$0xff] }
 0x3c5   :  { %v1764_v51 = vld [vmem:[#allocation2 + $0x170] sm:$0xff] }
 0x3c6   :  { %1483 = vst [vmem:[#allocation11 + $0x90] sm:$0xff] %v1355_v49  ;;  %1484 = vst [vmem:[#allocation11 + $0x98] sm:$0xff] %v1356_v61 }
 0x3c7   :  { %1489 = vst [vmem:[#allocation11 + $0xc0] sm:$0xff] %v1361_v28  ;;  %1490 = vst [vmem:[#allocation11 + $0xc8] sm:$0xff] %v1362_v52  ;;  %v1119_v62 = vpop.permute.xlu1 %1118  ;;  %v1131_v14 = vpop.permute.xlu0 %1130 }
 0x3c8   :  { %v1359_v2 = vmul.f32 %v1740_v0, %v1119_v62  ;;  %v1360_v7 = vmul.f32 %v1741_v1, %v1119_v62  ;;  %v1365_v10 = vmul.f32 %v1742_v8, %v1131_v14  ;;  %v1366_v24 = vmul.f32 %v1743_v11, %v1131_v14  ;;  %v1765_v62 = vld [vmem:[#allocation2 + $0x178] sm:$0xff]  ;;  %v1766_v0 = vld [vmem:[#allocation2 + $0x1a0] sm:$0xff]  ;;  %v1767_v1 = vld [vmem:[#allocation2 + $0x1a8] sm:$0xff] }
 0x3c9   :  { %v1768_v11 = vld [vmem:[#allocation2 + $0x190] sm:$0xff] }
 0x3ca   :  { %1487 = vst [vmem:[#allocation11 + $0xb0] sm:$0xff] %v1359_v2  ;;  %1488 = vst [vmem:[#allocation11 + $0xb8] sm:$0xff] %v1360_v7 }
 0x3cb   :  { %1493 = vst [vmem:[#allocation11 + $0xe0] sm:$0xff] %v1365_v10  ;;  %1494 = vst [vmem:[#allocation11 + $0xe8] sm:$0xff] %v1366_v24  ;;  %v1127_v53 = vpop.permute.xlu1 %1126  ;;  %v1142_v36 = vpop.permute.xlu0 %1141 }
 0x3cc   :  { %v1363_v37 = vmul.f32 %v1744_v23, %v1127_v53  ;;  %v1364_v9 = vmul.f32 %v1745_v31, %v1127_v53  ;;  %v1369_v55 = vmul.f32 %v1746_v32, %v1142_v36  ;;  %v1370_v54 = vmul.f32 %v1747_v41, %v1142_v36  ;;  %v1769_v53 = vld [vmem:[#allocation2 + $0x198] sm:$0xff]  ;;  %v1770_v23 = vld [vmem:[#allocation2 + $0x1c0] sm:$0xff]  ;;  %v1771_v31 = vld [vmem:[#allocation2 + $0x1c8] sm:$0xff] }
 0x3cd   :  { %v1772_v41 = vld [vmem:[#allocation2 + $0x1b0] sm:$0xff] }
 0x3ce   :  { %1491 = vst [vmem:[#allocation11 + $0xd0] sm:$0xff] %v1363_v37  ;;  %1492 = vst [vmem:[#allocation11 + $0xd8] sm:$0xff] %v1364_v9 }
 0x3cf   :  { %1497 = vst [vmem:[#allocation11 + $0x100] sm:$0xff] %v1369_v55  ;;  %1498 = vst [vmem:[#allocation11 + $0x108] sm:$0xff] %v1370_v54  ;;  %v1135_v19 = vpop.permute.xlu1 %1134  ;;  %v1150_v60 = vpop.permute.xlu0 %1149 }
 0x3d0   :  { %v1367_v17 = vmul.f32 %v1748_v26, %v1135_v19  ;;  %v1368_v25 = vmul.f32 %v1749_v33, %v1135_v19  ;;  %v1373_v21 = vmul.f32 %v1750_v16, %v1150_v60  ;;  %v1374_v30 = vmul.f32 %v1751_v56, %v1150_v60  ;;  %v1773_v19 = vld [vmem:[#allocation2 + $0x1b8] sm:$0xff]  ;;  %v1774_v26 = vld [vmem:[#allocation2 + $0x1e0] sm:$0xff]  ;;  %v1775_v33 = vld [vmem:[#allocation2 + $0x1e8] sm:$0xff] }
 0x3d1   :  { %v1776_v56 = vld [vmem:[#allocation2 + $0x1d0] sm:$0xff] }
 0x3d2   :  { %1495 = vst [vmem:[#allocation11 + $0xf0] sm:$0xff] %v1367_v17  ;;  %1496 = vst [vmem:[#allocation11 + $0xf8] sm:$0xff] %v1368_v25 }
 0x3d3   :  { %1501 = vst [vmem:[#allocation11 + $0x120] sm:$0xff] %v1373_v21  ;;  %1502 = vst [vmem:[#allocation11 + $0x128] sm:$0xff] %v1374_v30  ;;  %v1146_v35 = vpop.permute.xlu1 %1145  ;;  %v1158_v3 = vpop.permute.xlu0 %1157 }
 0x3d4   :  { %v1371_v29 = vmul.f32 %v1752_v42, %v1146_v35  ;;  %v1372_v57 = vmul.f32 %v1753_v27, %v1146_v35  ;;  %v1377_v12 = vmul.f32 %v1754_v34, %v1158_v3  ;;  %v1378_v43 = vmul.f32 %v1755_v5, %v1158_v3  ;;  %v1777_v35 = vld [vmem:[#allocation2 + $0x1d8] sm:$0xff]  ;;  %v1778_v42 = vld [vmem:[#allocation2 + $0x200] sm:$0xff]  ;;  %v1779_v27 = vld [vmem:[#allocation2 + $0x208] sm:$0xff] }
 0x3d5   :  { %v1780_v5 = vld [vmem:[#allocation2 + $0x1f0] sm:$0xff] }
 0x3d6   :  { %1499 = vst [vmem:[#allocation11 + $0x110] sm:$0xff] %v1371_v29  ;;  %1500 = vst [vmem:[#allocation11 + $0x118] sm:$0xff] %v1372_v57 }
 0x3d7   :  { %1505 = vst [vmem:[#allocation11 + $0x140] sm:$0xff] %v1377_v12  ;;  %1506 = vst [vmem:[#allocation11 + $0x148] sm:$0xff] %v1378_v43  ;;  %v1154_v22 = vpop.permute.xlu1 %1153  ;;  %v1166_v4 = vpop.permute.xlu0 %1165 }
 0x3d8   :  { %v1375_v40 = vmul.f32 %v1756_v38, %v1154_v22  ;;  %v1376_v58 = vmul.f32 %v1757_v63, %v1154_v22  ;;  %v1381_v6 = vmul.f32 %v1758_v44, %v1166_v4  ;;  %v1382_v39 = vmul.f32 %v1759_v15, %v1166_v4  ;;  %v1781_v22 = vld [vmem:[#allocation2 + $0x1f8] sm:$0xff]  ;;  %v1782_v38 = vld [vmem:[#allocation2 + $0x220] sm:$0xff]  ;;  %v1783_v63 = vld [vmem:[#allocation2 + $0x228] sm:$0xff] }
 0x3d9   :  { %v1784_v15 = vld [vmem:[#allocation2 + $0x210] sm:$0xff] }
 0x3da   :  { %1503 = vst [vmem:[#allocation11 + $0x130] sm:$0xff] %v1375_v40  ;;  %1504 = vst [vmem:[#allocation11 + $0x138] sm:$0xff] %v1376_v58 }
 0x3db   :  { %1509 = vst [vmem:[#allocation11 + $0x160] sm:$0xff] %v1381_v6  ;;  %1510 = vst [vmem:[#allocation11 + $0x168] sm:$0xff] %v1382_v39  ;;  %v1162_v59 = vpop.permute.xlu1 %1161  ;;  %v1174_v46 = vpop.permute.xlu0 %1173 }
 0x3dc   :  { %v1379_v47 = vmul.f32 %v1760_v45, %v1162_v59  ;;  %v1380_v48 = vmul.f32 %v1761_v13, %v1162_v59  ;;  %v1385_v49 = vmul.f32 %v1762_v20, %v1174_v46  ;;  %v1386_v61 = vmul.f32 %v1763_v50, %v1174_v46  ;;  %v1785_v59 = vld [vmem:[#allocation2 + $0x218] sm:$0xff]  ;;  %v1786_v45 = vld [vmem:[#allocation2 + $0x240] sm:$0xff]  ;;  %v1787_v13 = vld [vmem:[#allocation2 + $0x248] sm:$0xff] }
 0x3dd   :  { %v1788_v50 = vld [vmem:[#allocation2 + $0x230] sm:$0xff] }
 0x3de   :  { %1507 = vst [vmem:[#allocation11 + $0x150] sm:$0xff] %v1379_v47  ;;  %1508 = vst [vmem:[#allocation11 + $0x158] sm:$0xff] %v1380_v48 }
 0x3df   :  { %1513 = vst [vmem:[#allocation11 + $0x180] sm:$0xff] %v1385_v49  ;;  %1514 = vst [vmem:[#allocation11 + $0x188] sm:$0xff] %v1386_v61  ;;  %v1170_v18 = vpop.permute.xlu1 %1169  ;;  %v1182_v28 = vpop.permute.xlu0 %1181 }
 0x3e0   :  { %v1383_v52 = vmul.f32 %v1764_v51, %v1170_v18  ;;  %v1384_v14 = vmul.f32 %v1765_v62, %v1170_v18  ;;  %v1389_v2 = vmul.f32 %v1766_v0, %v1182_v28  ;;  %v1390_v7 = vmul.f32 %v1767_v1, %v1182_v28  ;;  %v1789_v18 = vld [vmem:[#allocation2 + $0x238] sm:$0xff]  ;;  %v1790_v51 = vld [vmem:[#allocation2 + $0x260] sm:$0xff]  ;;  %v1791_v62 = vld [vmem:[#allocation2 + $0x268] sm:$0xff] }
 0x3e1   :  { %v1792_v1 = vld [vmem:[#allocation2 + $0x250] sm:$0xff] }
 0x3e2   :  { %1511 = vst [vmem:[#allocation11 + $0x170] sm:$0xff] %v1383_v52  ;;  %1512 = vst [vmem:[#allocation11 + $0x178] sm:$0xff] %v1384_v14 }
 0x3e3   :  { %1517 = vst [vmem:[#allocation11 + $0x1a0] sm:$0xff] %v1389_v2  ;;  %1518 = vst [vmem:[#allocation11 + $0x1a8] sm:$0xff] %v1390_v7  ;;  %v1178_v8 = vpop.permute.xlu1 %1177  ;;  %v1190_v10 = vpop.permute.xlu0 %1189 }
 0x3e4   :  { %v1387_v24 = vmul.f32 %v1768_v11, %v1178_v8  ;;  %v1388_v36 = vmul.f32 %v1769_v53, %v1178_v8  ;;  %v1393_v37 = vmul.f32 %v1770_v23, %v1190_v10  ;;  %v1394_v9 = vmul.f32 %v1771_v31, %v1190_v10  ;;  %v1793_v8 = vld [vmem:[#allocation2 + $0x258] sm:$0xff]  ;;  %v1794_v11 = vld [vmem:[#allocation2 + $0x280] sm:$0xff]  ;;  %v1795_v53 = vld [vmem:[#allocation2 + $0x288] sm:$0xff] }
 0x3e5   :  { %v1796_v31 = vld [vmem:[#allocation2 + $0x270] sm:$0xff] }
 0x3e6   :  { %1515 = vst [vmem:[#allocation11 + $0x190] sm:$0xff] %v1387_v24  ;;  %1516 = vst [vmem:[#allocation11 + $0x198] sm:$0xff] %v1388_v36 }
 0x3e7   :  { %1521 = vst [vmem:[#allocation11 + $0x1c0] sm:$0xff] %v1393_v37  ;;  %1522 = vst [vmem:[#allocation11 + $0x1c8] sm:$0xff] %v1394_v9  ;;  %v1186_v32 = vpop.permute.xlu1 %1185  ;;  %v1198_v55 = vpop.permute.xlu0 %1197 }
 0x3e8   :  { %v1391_v54 = vmul.f32 %v1772_v41, %v1186_v32  ;;  %v1392_v60 = vmul.f32 %v1773_v19, %v1186_v32  ;;  %v1397_v17 = vmul.f32 %v1774_v26, %v1198_v55  ;;  %v1398_v25 = vmul.f32 %v1775_v33, %v1198_v55  ;;  %v1797_v32 = vld [vmem:[#allocation2 + $0x278] sm:$0xff]  ;;  %v1798_v41 = vld [vmem:[#allocation2 + $0x2a0] sm:$0xff]  ;;  %v1799_v19 = vld [vmem:[#allocation2 + $0x2a8] sm:$0xff] }
 0x3e9   :  { %v1800_v33 = vld [vmem:[#allocation2 + $0x290] sm:$0xff] }
 0x3ea   :  { %1519 = vst [vmem:[#allocation11 + $0x1b0] sm:$0xff] %v1391_v54  ;;  %1520 = vst [vmem:[#allocation11 + $0x1b8] sm:$0xff] %v1392_v60 }
 0x3eb   :  { %1525 = vst [vmem:[#allocation11 + $0x1e0] sm:$0xff] %v1397_v17  ;;  %1526 = vst [vmem:[#allocation11 + $0x1e8] sm:$0xff] %v1398_v25  ;;  %v1194_v16 = vpop.permute.xlu1 %1193  ;;  %v1209_v21 = vpop.permute.xlu0 %1208 }
 0x3ec   :  { %v1395_v30 = vmul.f32 %v1776_v56, %v1194_v16  ;;  %v1396_v3 = vmul.f32 %v1777_v35, %v1194_v16  ;;  %v1401_v29 = vmul.f32 %v1778_v42, %v1209_v21  ;;  %v1402_v57 = vmul.f32 %v1779_v27, %v1209_v21  ;;  %v1801_v16 = vld [vmem:[#allocation2 + $0x298] sm:$0xff]  ;;  %v1802_v56 = vld [vmem:[#allocation2 + $0x2c0] sm:$0xff]  ;;  %v1803_v35 = vld [vmem:[#allocation2 + $0x2c8] sm:$0xff] }
 0x3ed   :  { %v1804_v27 = vld [vmem:[#allocation2 + $0x2b0] sm:$0xff] }
 0x3ee   :  { %1523 = vst [vmem:[#allocation11 + $0x1d0] sm:$0xff] %v1395_v30  ;;  %1524 = vst [vmem:[#allocation11 + $0x1d8] sm:$0xff] %v1396_v3 }
 0x3ef   :  { %1529 = vst [vmem:[#allocation11 + $0x200] sm:$0xff] %v1401_v29  ;;  %1530 = vst [vmem:[#allocation11 + $0x208] sm:$0xff] %v1402_v57  ;;  %v1202_v34 = vpop.permute.xlu1 %1201  ;;  %v1217_v12 = vpop.permute.xlu0 %1216 }
 0x3f0   :  { %v1399_v43 = vmul.f32 %v1780_v5, %v1202_v34  ;;  %v1400_v4 = vmul.f32 %v1781_v22, %v1202_v34  ;;  %v1405_v40 = vmul.f32 %v1782_v38, %v1217_v12  ;;  %v1406_v58 = vmul.f32 %v1783_v63, %v1217_v12  ;;  %v1805_v34 = vld [vmem:[#allocation2 + $0x2b8] sm:$0xff]  ;;  %v1806_v5 = vld [vmem:[#allocation2 + $0x2e0] sm:$0xff]  ;;  %v1807_v22 = vld [vmem:[#allocation2 + $0x2e8] sm:$0xff] }
 0x3f1   :  { %v1808_v63 = vld [vmem:[#allocation2 + $0x2d0] sm:$0xff] }
 0x3f2   :  { %1527 = vst [vmem:[#allocation11 + $0x1f0] sm:$0xff] %v1399_v43  ;;  %1528 = vst [vmem:[#allocation11 + $0x1f8] sm:$0xff] %v1400_v4 }
 0x3f3   :  { %1533 = vst [vmem:[#allocation11 + $0x220] sm:$0xff] %v1405_v40  ;;  %1534 = vst [vmem:[#allocation11 + $0x228] sm:$0xff] %v1406_v58  ;;  %v1213_v44 = vpop.permute.xlu1 %1212  ;;  %v1225_v6 = vpop.permute.xlu0 %1224 }
 0x3f4   :  { %v1403_v39 = vmul.f32 %v1784_v15, %v1213_v44  ;;  %v1404_v46 = vmul.f32 %v1785_v59, %v1213_v44  ;;  %v1409_v47 = vmul.f32 %v1786_v45, %v1225_v6  ;;  %v1410_v48 = vmul.f32 %v1787_v13, %v1225_v6  ;;  %v1809_v44 = vld [vmem:[#allocation2 + $0x2d8] sm:$0xff]  ;;  %v1810_v15 = vld [vmem:[#allocation2 + $0x300] sm:$0xff]  ;;  %v1811_v59 = vld [vmem:[#allocation2 + $0x308] sm:$0xff] }
 0x3f5   :  { %v1812_v13 = vld [vmem:[#allocation2 + $0x2f0] sm:$0xff] }
 0x3f6   :  { %1531 = vst [vmem:[#allocation11 + $0x210] sm:$0xff] %v1403_v39  ;;  %1532 = vst [vmem:[#allocation11 + $0x218] sm:$0xff] %v1404_v46 }
 0x3f7   :  { %1537 = vst [vmem:[#allocation11 + $0x240] sm:$0xff] %v1409_v47  ;;  %1538 = vst [vmem:[#allocation11 + $0x248] sm:$0xff] %v1410_v48  ;;  %v1221_v20 = vpop.permute.xlu1 %1220  ;;  %v1233_v49 = vpop.permute.xlu0 %1232 }
 0x3f8   :  { %v1407_v61 = vmul.f32 %v1788_v50, %v1221_v20  ;;  %v1408_v28 = vmul.f32 %v1789_v18, %v1221_v20  ;;  %v1413_v52 = vmul.f32 %v1790_v51, %v1233_v49  ;;  %v1414_v14 = vmul.f32 %v1791_v62, %v1233_v49  ;;  %v1813_v20 = vld [vmem:[#allocation2 + $0x2f8] sm:$0xff]  ;;  %v1814_v50 = vld [vmem:[#allocation2 + $0x320] sm:$0xff]  ;;  %v1815_v18 = vld [vmem:[#allocation2 + $0x328] sm:$0xff] }
 0x3f9   :  { %v1816_v62 = vld [vmem:[#allocation2 + $0x310] sm:$0xff] }
 0x3fa   :  { %1535 = vst [vmem:[#allocation11 + $0x230] sm:$0xff] %v1407_v61  ;;  %1536 = vst [vmem:[#allocation11 + $0x238] sm:$0xff] %v1408_v28 }
 0x3fb   :  { %1541 = vst [vmem:[#allocation11 + $0x260] sm:$0xff] %v1413_v52  ;;  %1542 = vst [vmem:[#allocation11 + $0x268] sm:$0xff] %v1414_v14  ;;  %v1229_v0 = vpop.permute.xlu1 %1228  ;;  %v1241_v2 = vpop.permute.xlu0 %1240 }
 0x3fc   :  { %v1411_v7 = vmul.f32 %v1792_v1, %v1229_v0  ;;  %v1412_v10 = vmul.f32 %v1793_v8, %v1229_v0  ;;  %v1417_v24 = vmul.f32 %v1794_v11, %v1241_v2  ;;  %v1418_v36 = vmul.f32 %v1795_v53, %v1241_v2  ;;  %v1817_v0 = vld [vmem:[#allocation2 + $0x318] sm:$0xff]  ;;  %v1818_v1 = vld [vmem:[#allocation2 + $0x340] sm:$0xff]  ;;  %v1819_v8 = vld [vmem:[#allocation2 + $0x348] sm:$0xff] }
 0x3fd   :  { %v1820_v53 = vld [vmem:[#allocation2 + $0x330] sm:$0xff] }
 0x3fe   :  { %1539 = vst [vmem:[#allocation11 + $0x250] sm:$0xff] %v1411_v7  ;;  %1540 = vst [vmem:[#allocation11 + $0x258] sm:$0xff] %v1412_v10 }
 0x3ff   :  { %1545 = vst [vmem:[#allocation11 + $0x280] sm:$0xff] %v1417_v24  ;;  %1546 = vst [vmem:[#allocation11 + $0x288] sm:$0xff] %v1418_v36  ;;  %v1237_v23 = vpop.permute.xlu1 %1236  ;;  %v1249_v37 = vpop.permute.xlu0 %1248 }
 0x400   :  { %v1415_v9 = vmul.f32 %v1796_v31, %v1237_v23  ;;  %v1416_v55 = vmul.f32 %v1797_v32, %v1237_v23  ;;  %v1421_v54 = vmul.f32 %v1798_v41, %v1249_v37  ;;  %v1422_v60 = vmul.f32 %v1799_v19, %v1249_v37  ;;  %v1821_v23 = vld [vmem:[#allocation2 + $0x338] sm:$0xff]  ;;  %v1822_v31 = vld [vmem:[#allocation2 + $0x360] sm:$0xff]  ;;  %v1823_v32 = vld [vmem:[#allocation2 + $0x368] sm:$0xff] }
 0x401   :  { %v1824_v19 = vld [vmem:[#allocation2 + $0x350] sm:$0xff] }
 0x402   :  { %1543 = vst [vmem:[#allocation11 + $0x270] sm:$0xff] %v1415_v9  ;;  %1544 = vst [vmem:[#allocation11 + $0x278] sm:$0xff] %v1416_v55 }
 0x403   :  { %1549 = vst [vmem:[#allocation11 + $0x2a0] sm:$0xff] %v1421_v54  ;;  %1550 = vst [vmem:[#allocation11 + $0x2a8] sm:$0xff] %v1422_v60  ;;  %v1245_v26 = vpop.permute.xlu1 %1244  ;;  %v1257_v17 = vpop.permute.xlu0 %1256 }
 0x404   :  { %v1419_v25 = vmul.f32 %v1800_v33, %v1245_v26  ;;  %v1420_v21 = vmul.f32 %v1801_v16, %v1245_v26  ;;  %v1425_v30 = vmul.f32 %v1802_v56, %v1257_v17  ;;  %v1426_v3 = vmul.f32 %v1803_v35, %v1257_v17  ;;  %v1825_v26 = vld [vmem:[#allocation2 + $0x358] sm:$0xff]  ;;  %v1826_v33 = vld [vmem:[#allocation2 + $0x380] sm:$0xff]  ;;  %v1827_v16 = vld [vmem:[#allocation2 + $0x388] sm:$0xff] }
 0x405   :  { %v1828_v35 = vld [vmem:[#allocation2 + $0x370] sm:$0xff] }
 0x406   :  { %1547 = vst [vmem:[#allocation11 + $0x290] sm:$0xff] %v1419_v25  ;;  %1548 = vst [vmem:[#allocation11 + $0x298] sm:$0xff] %v1420_v21 }
 0x407   :  { %1553 = vst [vmem:[#allocation11 + $0x2c0] sm:$0xff] %v1425_v30  ;;  %1554 = vst [vmem:[#allocation11 + $0x2c8] sm:$0xff] %v1426_v3  ;;  %v1253_v42 = vpop.permute.xlu1 %1252  ;;  %v1265_v29 = vpop.permute.xlu0 %1264 }
 0x408   :  { %v1423_v57 = vmul.f32 %v1804_v27, %v1253_v42  ;;  %v1424_v12 = vmul.f32 %v1805_v34, %v1253_v42  ;;  %v1429_v43 = vmul.f32 %v1806_v5, %v1265_v29  ;;  %v1430_v4 = vmul.f32 %v1807_v22, %v1265_v29  ;;  %v1829_v42 = vld [vmem:[#allocation2 + $0x378] sm:$0xff]  ;;  %v1830_v27 = vld [vmem:[#allocation2 + $0x3a0] sm:$0xff]  ;;  %v1831_v34 = vld [vmem:[#allocation2 + $0x3a8] sm:$0xff] }
 0x409   :  { %v1832_v22 = vld [vmem:[#allocation2 + $0x390] sm:$0xff] }
 0x40a   :  { %1551 = vst [vmem:[#allocation11 + $0x2b0] sm:$0xff] %v1423_v57  ;;  %1552 = vst [vmem:[#allocation11 + $0x2b8] sm:$0xff] %v1424_v12 }
 0x40b   :  { %1557 = vst [vmem:[#allocation11 + $0x2e0] sm:$0xff] %v1429_v43  ;;  %1558 = vst [vmem:[#allocation11 + $0x2e8] sm:$0xff] %v1430_v4  ;;  %v1261_v38 = vpop.permute.xlu1 %1260  ;;  %v1276_v40 = vpop.permute.xlu0 %1275 }
 0x40c   :  { %v1427_v58 = vmul.f32 %v1808_v63, %v1261_v38  ;;  %v1428_v6 = vmul.f32 %v1809_v44, %v1261_v38  ;;  %v1433_v39 = vmul.f32 %v1810_v15, %v1276_v40  ;;  %v1434_v46 = vmul.f32 %v1811_v59, %v1276_v40  ;;  %v1833_v38 = vld [vmem:[#allocation2 + $0x398] sm:$0xff]  ;;  %v1834_v63 = vld [vmem:[#allocation2 + $0x3c0] sm:$0xff]  ;;  %v1835_v44 = vld [vmem:[#allocation2 + $0x3c8] sm:$0xff] }
 0x40d   :  { %v1836_v59 = vld [vmem:[#allocation2 + $0x3b0] sm:$0xff] }
 0x40e   :  { %1555 = vst [vmem:[#allocation11 + $0x2d0] sm:$0xff] %v1427_v58  ;;  %1556 = vst [vmem:[#allocation11 + $0x2d8] sm:$0xff] %v1428_v6 }
 0x40f   :  { %1561 = vst [vmem:[#allocation11 + $0x300] sm:$0xff] %v1433_v39  ;;  %1562 = vst [vmem:[#allocation11 + $0x308] sm:$0xff] %v1434_v46  ;;  %v1269_v45 = vpop.permute.xlu1 %1268  ;;  %v1284_v47 = vpop.permute.xlu0 %1283 }
 0x410   :  { %v1431_v48 = vmul.f32 %v1812_v13, %v1269_v45  ;;  %v1432_v49 = vmul.f32 %v1813_v20, %v1269_v45  ;;  %v1437_v61 = vmul.f32 %v1814_v50, %v1284_v47  ;;  %v1438_v28 = vmul.f32 %v1815_v18, %v1284_v47  ;;  %v1837_v45 = vld [vmem:[#allocation2 + $0x3b8] sm:$0xff]  ;;  %v1838_v13 = vld [vmem:[#allocation2 + $0x3e0] sm:$0xff]  ;;  %v1839_v20 = vld [vmem:[#allocation2 + $0x3e8] sm:$0xff] }
 0x412   :  { %1559 = vst [vmem:[#allocation11 + $0x2f0] sm:$0xff] %v1431_v48  ;;  %1560 = vst [vmem:[#allocation11 + $0x2f8] sm:$0xff] %v1432_v49 }
 0x413   :  { %1565 = vst [vmem:[#allocation11 + $0x320] sm:$0xff] %v1437_v61  ;;  %1566 = vst [vmem:[#allocation11 + $0x328] sm:$0xff] %v1438_v28  ;;  %v1280_v51 = vpop.permute.xlu1 %1279  ;;  %v1292_v52 = vpop.permute.xlu0 %1291  ;;  %v1840_v61 = vld [vmem:[#allocation2 + $0x3d0] sm:$0xff]  ;;  %v1841_v28 = vld [vmem:[#allocation2 + $0x3d8] sm:$0xff] }
 0x414   :  { %v1435_v14 = vmul.f32 %v1816_v62, %v1280_v51  ;;  %v1436_v2 = vmul.f32 %v1817_v0, %v1280_v51  ;;  %v1441_v7 = vmul.f32 %v1818_v1, %v1292_v52  ;;  %v1442_v10 = vmul.f32 %v1819_v8, %v1292_v52  ;;  %v1842_v62 = vld [vmem:[#allocation2 + $0x3f0] sm:$0xff]  ;;  %v1843_v0 = vld [vmem:[#allocation2 + $0x3f8] sm:$0xff] }
 0x416   :  { %1563 = vst [vmem:[#allocation11 + $0x310] sm:$0xff] %v1435_v14  ;;  %1564 = vst [vmem:[#allocation11 + $0x318] sm:$0xff] %v1436_v2 }
 0x417   :  { %1569 = vst [vmem:[#allocation11 + $0x340] sm:$0xff] %v1441_v7  ;;  %1570 = vst [vmem:[#allocation11 + $0x348] sm:$0xff] %v1442_v10  ;;  %v1288_v11 = vpop.permute.xlu1 %1287  ;;  %v1300_v24 = vpop.permute.xlu0 %1299 }
 0x418   :  { %v1439_v36 = vmul.f32 %v1820_v53, %v1288_v11  ;;  %v1440_v37 = vmul.f32 %v1821_v23, %v1288_v11  ;;  %v1445_v9 = vmul.f32 %v1822_v31, %v1300_v24  ;;  %v1446_v55 = vmul.f32 %v1823_v32, %v1300_v24 }
 0x41a   :  { %1567 = vst [vmem:[#allocation11 + $0x330] sm:$0xff] %v1439_v36  ;;  %1568 = vst [vmem:[#allocation11 + $0x338] sm:$0xff] %v1440_v37 }
 0x41b   :  { %1573 = vst [vmem:[#allocation11 + $0x360] sm:$0xff] %v1445_v9  ;;  %1574 = vst [vmem:[#allocation11 + $0x368] sm:$0xff] %v1446_v55  ;;  %v1296_v41 = vpop.permute.xlu1 %1295  ;;  %v1308_v54 = vpop.permute.xlu0 %1307 }
 0x41c   :  { %v1443_v60 = vmul.f32 %v1824_v19, %v1296_v41  ;;  %v1444_v17 = vmul.f32 %v1825_v26, %v1296_v41  ;;  %v1449_v25 = vmul.f32 %v1826_v33, %v1308_v54  ;;  %v1450_v21 = vmul.f32 %v1827_v16, %v1308_v54 }
 0x41e   :  { %1571 = vst [vmem:[#allocation11 + $0x350] sm:$0xff] %v1443_v60  ;;  %1572 = vst [vmem:[#allocation11 + $0x358] sm:$0xff] %v1444_v17 }
 0x41f   :  { %1577 = vst [vmem:[#allocation11 + $0x380] sm:$0xff] %v1449_v25  ;;  %1578 = vst [vmem:[#allocation11 + $0x388] sm:$0xff] %v1450_v21  ;;  %v1304_v56 = vpop.permute.xlu1 %1303  ;;  %v1316_v30 = vpop.permute.xlu0 %1315 }
 0x420   :  { %v1447_v3 = vmul.f32 %v1828_v35, %v1304_v56  ;;  %v1448_v29 = vmul.f32 %v1829_v42, %v1304_v56  ;;  %v1453_v57 = vmul.f32 %v1830_v27, %v1316_v30  ;;  %v1454_v12 = vmul.f32 %v1831_v34, %v1316_v30 }
 0x422   :  { %1575 = vst [vmem:[#allocation11 + $0x370] sm:$0xff] %v1447_v3  ;;  %1576 = vst [vmem:[#allocation11 + $0x378] sm:$0xff] %v1448_v29 }
 0x423   :  { %1581 = vst [vmem:[#allocation11 + $0x3a0] sm:$0xff] %v1453_v57  ;;  %1582 = vst [vmem:[#allocation11 + $0x3a8] sm:$0xff] %v1454_v12  ;;  %v1312_v5 = vpop.permute.xlu1 %1311  ;;  %v1324_v43 = vpop.permute.xlu0 %1323 }
 0x424   :  { %v1451_v4 = vmul.f32 %v1832_v22, %v1312_v5  ;;  %v1452_v40 = vmul.f32 %v1833_v38, %v1312_v5  ;;  %v1457_v58 = vmul.f32 %v1834_v63, %v1324_v43  ;;  %v1458_v6 = vmul.f32 %v1835_v44, %v1324_v43 }
 0x426   :  { %1579 = vst [vmem:[#allocation11 + $0x390] sm:$0xff] %v1451_v4  ;;  %1580 = vst [vmem:[#allocation11 + $0x398] sm:$0xff] %v1452_v40 }
 0x427   :  { %1585 = vst [vmem:[#allocation11 + $0x3c0] sm:$0xff] %v1457_v58  ;;  %1586 = vst [vmem:[#allocation11 + $0x3c8] sm:$0xff] %v1458_v6  ;;  %v1320_v15 = vpop.permute.xlu1 %1319  ;;  %v1332_v39 = vpop.permute.xlu0 %1331 }
 0x428   :  { %v1455_v46 = vmul.f32 %v1836_v59, %v1320_v15  ;;  %v1456_v47 = vmul.f32 %v1837_v45, %v1320_v15  ;;  %v1461_v48 = vmul.f32 %v1838_v13, %v1332_v39  ;;  %v1462_v49 = vmul.f32 %v1839_v20, %v1332_v39 }
 0x42a   :  { %1583 = vst [vmem:[#allocation11 + $0x3b0] sm:$0xff] %v1455_v46  ;;  %1584 = vst [vmem:[#allocation11 + $0x3b8] sm:$0xff] %v1456_v47 }
 0x42b   :  { %1589 = vst [vmem:[#allocation11 + $0x3e0] sm:$0xff] %v1461_v48  ;;  %1590 = vst [vmem:[#allocation11 + $0x3e8] sm:$0xff] %v1462_v49  ;;  %v1328_v50 = vpop.permute.xlu1 %1327 }
 0x42c   :  { %v1459_v18 = vmul.f32 %v1840_v61, %v1328_v50  ;;  %v1460_v51 = vmul.f32 %v1841_v28, %v1328_v50 }
 0x42e   :  { %1587 = vst [vmem:[#allocation11 + $0x3d0] sm:$0xff] %v1459_v18  ;;  %1588 = vst [vmem:[#allocation11 + $0x3d8] sm:$0xff] %v1460_v51 }
 0x42f   :  { %v1336_v52 = vpop.permute.xlu1 %1335 }
 0x430   :  { %v1463_v14 = vmul.f32 %v1842_v62, %v1336_v52  ;;  %v1464_v2 = vmul.f32 %v1843_v0, %v1336_v52 }
 0x432   :  { %1591 = vst [vmem:[#allocation11 + $0x3f0] sm:$0xff] %v1463_v14  ;;  %1592 = vst [vmem:[#allocation11 + $0x3f8] sm:$0xff] %v1464_v2 }
 0x433   :  { %1965 = shalt.err (!%p1962_p2)
}
 0x434   :  { %s1966_s9 = scalar_lea.hbm %s2470_s5, 16384 }
 0x435   :  { %p1967_p3 = scmp.ne.s32.totalorder %s2470_s5, %s1966_s9  ;;  %p1970_p4 = scmp.lt.u32.totalorder %s1966_s9, %s2470_s5 }
 0x437   :  { %p1972_p5 = pnand %p1970_p4, %p1967_p3 }
 0x439   :  { %1975 = shalt.err (!%p1972_p5)
}
 0x43a   :  { %1604 = dma.vmem_to_hbm [thread:$0]  %s1599_s30, 16384, %s2470_s5, [#allocation4], %s1989_s3, %s1989_s3, %s1990_s28  }
 0x43b   :  { %1982 = dma.done.wait [#allocation4], 16384  }
 0x43c   :  { %1983 = vsyncadd [#allocation4], 4294950912 }
 0x43d   :  { %1608 = vsyncpa [#allocation3], 1 }
 0x43e   :  { %1609 = vsyncpa [#allocation6], 1 }
 0x43f   :  { %1610 = vsyncpa [#allocation9], 1 }
 0x440   :  { %1611 = vsyncpa [#allocation4], 1 }

</bundles_post_ra>
